<compile_context>
chip_gen: v7x
topology: tpu7x:2x2x1
jax: 0.10.0
libtpu: 0.0.40
codegen_flags: <defaults>
</compile_context>

<pallas_src>
import functools

import numpy as np
import jax
import jax.numpy as jnp
from jax.experimental import pallas as pl
from jax.experimental.pallas import tpu as pltpu

RADIUS = 5
SIGMA_1 = 4.0
SIGMA_2 = 10.0


def gaussian_kernel_np(radius: int = RADIUS, sigma: float = SIGMA_1) -> np.ndarray:
    """2-D spatial Gaussian, identical to the reference gaussian_kernel():
    exp(-(dx^2 + dy^2) / (2 * sigma^2)), center value 1.  (Used by the JAX ref.)"""
    x2 = np.linspace(-radius, radius, 2 * radius + 1) ** 2
    dist2 = (x2.reshape(-1, 1) + x2.reshape(1, -1)) / (sigma ** 2)
    return np.exp(-dist2 / 2.0).astype(np.float32)


def _gauss_1d(radius: int, sigma: float) -> np.ndarray:
    x = np.linspace(-radius, radius, 2 * radius + 1)
    return np.exp(-(x ** 2) / (2.0 * sigma ** 2))


def _toeplitz_band(n: int, radius: int, sigma: float) -> np.ndarray:
    """Banded symmetric Toeplitz T (n x n) such that (img @ T) equals a 1-D
    'same' Gaussian cross-correlation of each row of img with zero padding."""
    g1 = _gauss_1d(radius, sigma)
    idx = np.arange(n)
    d = idx[:, None] - idx[None, :]
    t = np.where(np.abs(d) <= radius, g1[np.clip(d + radius, 0, 2 * radius)], 0.0)
    return t.astype(np.float32)


def _ncut_kernel(labels_ref, inputs_ref, thb_ref, tw_ref, num_ref, den_ref,
                 *, sigma_2, H, W, C, K):
    n = pl.program_id(0)

    t_hb = thb_ref[...]          # (2K*H, 2K*H) block-diagonal H-axis Toeplitz
    t_w = tw_ref[...]            # (W, W)        W-axis Toeplitz

    inv_hw = 1.0 / float(H * W)
    inv_s2 = 1.0 / (float(sigma_2) ** 2)

    # Load class maps / channels once as plain 2-D (H, W) tiles.
    probs = [labels_ref[0, k] for k in range(K)]     # K x (H, W)
    chans = [inputs_ref[0, c] for c in range(C)]     # C x (H, W)

    # ---- pixel weights per class (class-mean relative, as in the reference) ----
    pw_rows = []   # probs_k * weights_k
    w_rows = []    # weights_k
    for k in range(K):
        pk = probs[k]
        pmean = jnp.sum(pk) * inv_hw + 1e-5                       # scalar
        diff = jnp.zeros((H, W), jnp.float32)
        for c in range(C):
            ch = chans[c]
            cmean = (jnp.sum(ch * pk) * inv_hw) / pmean           # scalar
            d = ch - cmean
            diff = diff + d * d
        wts = jnp.exp(-(diff * diff) * inv_s2)                    # (H, W)
        pw_rows.append(pk * wts)
        w_rows.append(wts)

    # ---- separable "same" Gaussian conv as two MXU matmuls on one slab ----
    # slab rows: [pw_0 .. pw_{K-1}, w_0 .. w_{K-1}], shape (2K*H, W)
    slab = jnp.concatenate(pw_rows + w_rows, axis=0)
    slab = jnp.dot(slab, t_w, preferred_element_type=jnp.float32)   # conv along W
    slab = jnp.dot(t_hb, slab, preferred_element_type=jnp.float32)  # conv along H

    # ---- per-(class, batch) partial sums of numerator / denominator ----
    for k in range(K):
        pk = probs[k]
        conv_pw = slab[k * H:(k + 1) * H, :]
        conv_w = slab[(K + k) * H:(K + k + 1) * H, :]
        num_ref[k, n] = jnp.sum(pk * conv_pw)
        den_ref[k, n] = jnp.sum(pk * conv_w)


def ncut_loss_2d(labels, inputs, radius=RADIUS, sigma_1=SIGMA_1, sigma_2=SIGMA_2):
    labels = labels.astype(jnp.float32)
    inputs = inputs.astype(jnp.float32)
    N, K, H, W = labels.shape
    _, C, _, _ = inputs.shape

    t_w = jnp.asarray(_toeplitz_band(W, radius, sigma_1))
    # Block-diagonal (2K copies) of the H-axis Toeplitz so the H-direction
    # convolution of all 2K stacked slabs is a single matmul.
    # TODO(synk): for very large K*H, switch to a per-class (H,H) matmul loop
    # instead of materializing the (2K*H)^2 block-diagonal.
    t_hb = jnp.asarray(np.kron(np.eye(2 * K, dtype=np.float32),
                               _toeplitz_band(H, radius, sigma_1)))

    kernel = functools.partial(_ncut_kernel, sigma_2=float(sigma_2),
                               H=H, W=W, C=C, K=K)

    num, den = pl.pallas_call(
        kernel,
        out_shape=(jax.ShapeDtypeStruct((K, N), jnp.float32),
                   jax.ShapeDtypeStruct((K, N), jnp.float32)),
        grid_spec=pltpu.PrefetchScalarGridSpec(
            num_scalar_prefetch=0,
            grid=(N,),
            in_specs=[
                pl.BlockSpec((1, K, H, W), lambda n: (n, 0, 0, 0)),      # labels
                pl.BlockSpec((1, C, H, W), lambda n: (n, 0, 0, 0)),      # inputs
                pl.BlockSpec((2 * K * H, 2 * K * H), lambda n: (0, 0)),  # T_H blk-diag
                pl.BlockSpec((W, W), lambda n: (0, 0)),                  # T_W
            ],
            out_specs=(
                pl.BlockSpec(memory_space=pltpu.MemorySpace.SMEM),
                pl.BlockSpec(memory_space=pltpu.MemorySpace.SMEM),
            ),
        ),
        # "arbitrary" keeps the untiled SMEM (K, N) outputs race-free; the whole
        # grid runs on one TensorCore (v7x megacore sharding intentionally off).
        compiler_params=pltpu.CompilerParams(
            dimension_semantics=("arbitrary",)),
    )(labels, inputs, t_hb, t_w)

    # Glue: per-class ratio, L1 vs zeros (== abs of a scalar), K - loss.
    num_k = jnp.sum(num, axis=1)
    den_k = jnp.sum(den, axis=1)
    loss = jnp.sum(jnp.abs(num_k / (den_k + 1e-6)))
    return jnp.float32(K) - loss


def ncut_loss_2d_ref(labels, inputs, radius=RADIUS, sigma_1=SIGMA_1, sigma_2=SIGMA_2):
    """Pure-JAX reference mirroring the PyTorch forward exactly."""
    N, K, H, W = labels.shape
    gk = jnp.asarray(gaussian_kernel_np(radius, sigma_1))[None, None]  # (1,1,ks,ks)

    def conv(x):
        return jax.lax.conv_general_dilated(
            x, gk, window_strides=(1, 1),
            padding=[(radius, radius), (radius, radius)],
            dimension_numbers=("NCHW", "OIHW", "NCHW"))

    loss = jnp.float32(0.0)
    for k in range(K):
        class_probs = labels[:, k:k + 1]
        class_mean = jnp.mean(inputs * class_probs, axis=(2, 3), keepdims=True) / (
            jnp.mean(class_probs, axis=(2, 3), keepdims=True) + 1e-5)
        diff = jnp.sum((inputs - class_mean) ** 2, axis=1, keepdims=True)
        weights = jnp.exp(-(diff ** 2) / (sigma_2 ** 2))
        numerator = jnp.sum(class_probs * conv(class_probs * weights))
        denominator = jnp.sum(class_probs * conv(weights))
        loss = loss + jnp.abs(numerator / (denominator + 1e-6))
    return jnp.float32(K) - loss


if __name__ == "__main__":
    key = jax.random.PRNGKey(0)
    k1, k2 = jax.random.split(key)
    N, K, C, H, W = 2, 4, 3, 16, 16

    logits = jax.random.normal(k1, (N, K, H, W), jnp.float32)
    labels = jax.nn.softmax(logits, axis=1)            # class probabilities
    inputs = jax.random.uniform(k2, (N, C, H, W), jnp.float32)

    out = ncut_loss_2d(labels, inputs)
    out = jax.block_until_ready(out)

    ref = jax.block_until_ready(ncut_loss_2d_ref(labels, inputs))
    assert jnp.allclose(out, ref, rtol=1e-3, atol=1e-3), (out, ref)

    print("KERNEL_OK")
</pallas_src>

<mosaic_0001>
module attributes {stable_mosaic.version = 11 : i64} {
  func.func @_ncut_kernel(%arg0: i32, %arg1: memref<1x4x16x16xf32, #tpu.memory_space<vmem>>, %arg2: memref<1x3x16x16xf32, #tpu.memory_space<vmem>>, %arg3: memref<128x128xf32, #tpu.memory_space<vmem>>, %arg4: memref<16x16xf32, #tpu.memory_space<vmem>>, %arg5: memref<4x2xf32, #tpu.memory_space<smem>>, %arg6: memref<4x2xf32, #tpu.memory_space<smem>>) attributes {dimension_semantics = [#tpu.dimension_semantics<arbitrary>], iteration_bounds = array<i64: 2>, scalar_prefetch = 0 : i64, scratch_operands = 0 : i64, tpu.core_type = #tpu.core_type<tc>, window_params = [{transform_indices = @transform_0, window_bounds = array<i64: 1, 4, 16, 16>}, {transform_indices = @transform_1, window_bounds = array<i64: 1, 3, 16, 16>}, {pipeline_mode = #tpu.pipeline_mode<synchronous>, transform_indices = @transform_2, window_bounds = array<i64: 128, 128>}, {pipeline_mode = #tpu.pipeline_mode<synchronous>, transform_indices = @transform_3, window_bounds = array<i64: 16, 16>}, {transform_indices = @transform_4, window_bounds = array<i64: 4, 2>}, {transform_indices = @transform_5, window_bounds = array<i64: 4, 2>}]} {
    %c0 = arith.constant 0 : index
    %c0_0 = arith.constant 0 : index
    %0 = vector.load %arg3[%c0, %c0_0] : memref<128x128xf32, #tpu.memory_space<vmem>>, vector<128x128xf32>
    %c0_1 = arith.constant 0 : index
    %c0_2 = arith.constant 0 : index
    %1 = vector.load %arg4[%c0_1, %c0_2] : memref<16x16xf32, #tpu.memory_space<vmem>>, vector<16x16xf32>
    %c0_3 = arith.constant 0 : index
    %c0_4 = arith.constant 0 : index
    %c0_5 = arith.constant 0 : index
    %c0_6 = arith.constant 0 : index
    %2 = vector.load %arg1[%c0_3, %c0_4, %c0_5, %c0_6] : memref<1x4x16x16xf32, #tpu.memory_space<vmem>>, vector<1x1x16x16xf32>
    %3 = vector.shape_cast %2 : vector<1x1x16x16xf32> to vector<16x16xf32>
    %c0_7 = arith.constant 0 : index
    %c1 = arith.constant 1 : index
    %c0_8 = arith.constant 0 : index
    %c0_9 = arith.constant 0 : index
    %4 = vector.load %arg1[%c0_7, %c1, %c0_8, %c0_9] : memref<1x4x16x16xf32, #tpu.memory_space<vmem>>, vector<1x1x16x16xf32>
    %5 = vector.shape_cast %4 : vector<1x1x16x16xf32> to vector<16x16xf32>
    %c0_10 = arith.constant 0 : index
    %c2 = arith.constant 2 : index
    %c0_11 = arith.constant 0 : index
    %c0_12 = arith.constant 0 : index
    %6 = vector.load %arg1[%c0_10, %c2, %c0_11, %c0_12] : memref<1x4x16x16xf32, #tpu.memory_space<vmem>>, vector<1x1x16x16xf32>
    %7 = vector.shape_cast %6 : vector<1x1x16x16xf32> to vector<16x16xf32>
    %c0_13 = arith.constant 0 : index
    %c3 = arith.constant 3 : index
    %c0_14 = arith.constant 0 : index
    %c0_15 = arith.constant 0 : index
    %8 = vector.load %arg1[%c0_13, %c3, %c0_14, %c0_15] : memref<1x4x16x16xf32, #tpu.memory_space<vmem>>, vector<1x1x16x16xf32>
    %9 = vector.shape_cast %8 : vector<1x1x16x16xf32> to vector<16x16xf32>
    %c0_16 = arith.constant 0 : index
    %c0_17 = arith.constant 0 : index
    %c0_18 = arith.constant 0 : index
    %c0_19 = arith.constant 0 : index
    %10 = vector.load %arg2[%c0_16, %c0_17, %c0_18, %c0_19] : memref<1x3x16x16xf32, #tpu.memory_space<vmem>>, vector<1x1x16x16xf32>
    %11 = vector.shape_cast %10 : vector<1x1x16x16xf32> to vector<16x16xf32>
    %c0_20 = arith.constant 0 : index
    %c1_21 = arith.constant 1 : index
    %c0_22 = arith.constant 0 : index
    %c0_23 = arith.constant 0 : index
    %12 = vector.load %arg2[%c0_20, %c1_21, %c0_22, %c0_23] : memref<1x3x16x16xf32, #tpu.memory_space<vmem>>, vector<1x1x16x16xf32>
    %13 = vector.shape_cast %12 : vector<1x1x16x16xf32> to vector<16x16xf32>
    %c0_24 = arith.constant 0 : index
    %c2_25 = arith.constant 2 : index
    %c0_26 = arith.constant 0 : index
    %c0_27 = arith.constant 0 : index
    %14 = vector.load %arg2[%c0_24, %c2_25, %c0_26, %c0_27] : memref<1x3x16x16xf32, #tpu.memory_space<vmem>>, vector<1x1x16x16xf32>
    %15 = vector.shape_cast %14 : vector<1x1x16x16xf32> to vector<16x16xf32>
    %16 = vector.shape_cast %3 : vector<16x16xf32> to vector<1x16x16xf32>
    %cst = arith.constant dense<0.000000e+00> : vector<1xf32>
    %17 = vector.multi_reduction <add>, %16, %cst [1, 2] : vector<1x16x16xf32> to vector<1xf32>
    %18 = vector.shape_cast %17 : vector<1xf32> to vector<1x1x1xf32>
    %19 = vector.extract %18[0, 0, 0] : f32 from vector<1x1x1xf32>
    %cst_28 = arith.constant 3.906250e-03 : f32
    %20 = arith.mulf %19, %cst_28 : f32
    %cst_29 = arith.constant 9.99999974E-6 : f32
    %21 = arith.addf %20, %cst_29 : f32
    %cst_30 = arith.constant 0.000000e+00 : f32
    %22 = vector.broadcast %cst_30 : f32 to vector<16x16xf32>
    %23 = arith.mulf %11, %3 : vector<16x16xf32>
    %24 = vector.shape_cast %23 : vector<16x16xf32> to vector<1x16x16xf32>
    %cst_31 = arith.constant dense<0.000000e+00> : vector<1xf32>
    %25 = vector.multi_reduction <add>, %24, %cst_31 [1, 2] : vector<1x16x16xf32> to vector<1xf32>
    %26 = vector.shape_cast %25 : vector<1xf32> to vector<1x1x1xf32>
    %27 = vector.extract %26[0, 0, 0] : f32 from vector<1x1x1xf32>
    %cst_32 = arith.constant 3.906250e-03 : f32
    %28 = arith.mulf %27, %cst_32 : f32
    %29 = arith.divf %28, %21 : f32
    %30 = vector.broadcast %29 : f32 to vector<16x16xf32>
    %31 = arith.subf %11, %30 : vector<16x16xf32>
    %32 = arith.mulf %31, %31 : vector<16x16xf32>
    %33 = arith.addf %22, %32 : vector<16x16xf32>
    %34 = arith.mulf %13, %3 : vector<16x16xf32>
    %35 = vector.shape_cast %34 : vector<16x16xf32> to vector<1x16x16xf32>
    %cst_33 = arith.constant dense<0.000000e+00> : vector<1xf32>
    %36 = vector.multi_reduction <add>, %35, %cst_33 [1, 2] : vector<1x16x16xf32> to vector<1xf32>
    %37 = vector.shape_cast %36 : vector<1xf32> to vector<1x1x1xf32>
    %38 = vector.extract %37[0, 0, 0] : f32 from vector<1x1x1xf32>
    %cst_34 = arith.constant 3.906250e-03 : f32
    %39 = arith.mulf %38, %cst_34 : f32
    %40 = arith.divf %39, %21 : f32
    %41 = vector.broadcast %40 : f32 to vector<16x16xf32>
    %42 = arith.subf %13, %41 : vector<16x16xf32>
    %43 = arith.mulf %42, %42 : vector<16x16xf32>
    %44 = arith.addf %33, %43 : vector<16x16xf32>
    %45 = arith.mulf %15, %3 : vector<16x16xf32>
    %46 = vector.shape_cast %45 : vector<16x16xf32> to vector<1x16x16xf32>
    %cst_35 = arith.constant dense<0.000000e+00> : vector<1xf32>
    %47 = vector.multi_reduction <add>, %46, %cst_35 [1, 2] : vector<1x16x16xf32> to vector<1xf32>
    %48 = vector.shape_cast %47 : vector<1xf32> to vector<1x1x1xf32>
    %49 = vector.extract %48[0, 0, 0] : f32 from vector<1x1x1xf32>
    %cst_36 = arith.constant 3.906250e-03 : f32
    %50 = arith.mulf %49, %cst_36 : f32
    %51 = arith.divf %50, %21 : f32
    %52 = vector.broadcast %51 : f32 to vector<16x16xf32>
    %53 = arith.subf %15, %52 : vector<16x16xf32>
    %54 = arith.mulf %53, %53 : vector<16x16xf32>
    %55 = arith.addf %44, %54 : vector<16x16xf32>
    %56 = arith.mulf %55, %55 : vector<16x16xf32>
    %cst_37 = arith.constant 0.000000e+00 : f32
    %57 = vector.broadcast %cst_37 : f32 to vector<16x16xf32>
    %58 = arith.subf %57, %56 : vector<16x16xf32>
    %cst_38 = arith.constant 0.00999999977 : f32
    %59 = vector.broadcast %cst_38 : f32 to vector<16x16xf32>
    %60 = arith.mulf %58, %59 : vector<16x16xf32>
    %61 = math.exp %60 : vector<16x16xf32>
    %62 = arith.mulf %3, %61 : vector<16x16xf32>
    %63 = vector.shape_cast %5 : vector<16x16xf32> to vector<1x16x16xf32>
    %cst_39 = arith.constant dense<0.000000e+00> : vector<1xf32>
    %64 = vector.multi_reduction <add>, %63, %cst_39 [1, 2] : vector<1x16x16xf32> to vector<1xf32>
    %65 = vector.shape_cast %64 : vector<1xf32> to vector<1x1x1xf32>
    %66 = vector.extract %65[0, 0, 0] : f32 from vector<1x1x1xf32>
    %cst_40 = arith.constant 3.906250e-03 : f32
    %67 = arith.mulf %66, %cst_40 : f32
    %cst_41 = arith.constant 9.99999974E-6 : f32
    %68 = arith.addf %67, %cst_41 : f32
    %cst_42 = arith.constant 0.000000e+00 : f32
    %69 = vector.broadcast %cst_42 : f32 to vector<16x16xf32>
    %70 = arith.mulf %11, %5 : vector<16x16xf32>
    %71 = vector.shape_cast %70 : vector<16x16xf32> to vector<1x16x16xf32>
    %cst_43 = arith.constant dense<0.000000e+00> : vector<1xf32>
    %72 = vector.multi_reduction <add>, %71, %cst_43 [1, 2] : vector<1x16x16xf32> to vector<1xf32>
    %73 = vector.shape_cast %72 : vector<1xf32> to vector<1x1x1xf32>
    %74 = vector.extract %73[0, 0, 0] : f32 from vector<1x1x1xf32>
    %cst_44 = arith.constant 3.906250e-03 : f32
    %75 = arith.mulf %74, %cst_44 : f32
    %76 = arith.divf %75, %68 : f32
    %77 = vector.broadcast %76 : f32 to vector<16x16xf32>
    %78 = arith.subf %11, %77 : vector<16x16xf32>
    %79 = arith.mulf %78, %78 : vector<16x16xf32>
    %80 = arith.addf %69, %79 : vector<16x16xf32>
    %81 = arith.mulf %13, %5 : vector<16x16xf32>
    %82 = vector.shape_cast %81 : vector<16x16xf32> to vector<1x16x16xf32>
    %cst_45 = arith.constant dense<0.000000e+00> : vector<1xf32>
    %83 = vector.multi_reduction <add>, %82, %cst_45 [1, 2] : vector<1x16x16xf32> to vector<1xf32>
    %84 = vector.shape_cast %83 : vector<1xf32> to vector<1x1x1xf32>
    %85 = vector.extract %84[0, 0, 0] : f32 from vector<1x1x1xf32>
    %cst_46 = arith.constant 3.906250e-03 : f32
    %86 = arith.mulf %85, %cst_46 : f32
    %87 = arith.divf %86, %68 : f32
    %88 = vector.broadcast %87 : f32 to vector<16x16xf32>
    %89 = arith.subf %13, %88 : vector<16x16xf32>
    %90 = arith.mulf %89, %89 : vector<16x16xf32>
    %91 = arith.addf %80, %90 : vector<16x16xf32>
    %92 = arith.mulf %15, %5 : vector<16x16xf32>
    %93 = vector.shape_cast %92 : vector<16x16xf32> to vector<1x16x16xf32>
    %cst_47 = arith.constant dense<0.000000e+00> : vector<1xf32>
    %94 = vector.multi_reduction <add>, %93, %cst_47 [1, 2] : vector<1x16x16xf32> to vector<1xf32>
    %95 = vector.shape_cast %94 : vector<1xf32> to vector<1x1x1xf32>
    %96 = vector.extract %95[0, 0, 0] : f32 from vector<1x1x1xf32>
    %cst_48 = arith.constant 3.906250e-03 : f32
    %97 = arith.mulf %96, %cst_48 : f32
    %98 = arith.divf %97, %68 : f32
    %99 = vector.broadcast %98 : f32 to vector<16x16xf32>
    %100 = arith.subf %15, %99 : vector<16x16xf32>
    %101 = arith.mulf %100, %100 : vector<16x16xf32>
    %102 = arith.addf %91, %101 : vector<16x16xf32>
    %103 = arith.mulf %102, %102 : vector<16x16xf32>
    %cst_49 = arith.constant 0.000000e+00 : f32
    %104 = vector.broadcast %cst_49 : f32 to vector<16x16xf32>
    %105 = arith.subf %104, %103 : vector<16x16xf32>
    %cst_50 = arith.constant 0.00999999977 : f32
    %106 = vector.broadcast %cst_50 : f32 to vector<16x16xf32>
    %107 = arith.mulf %105, %106 : vector<16x16xf32>
    %108 = math.exp %107 : vector<16x16xf32>
    %109 = arith.mulf %5, %108 : vector<16x16xf32>
    %110 = vector.shape_cast %7 : vector<16x16xf32> to vector<1x16x16xf32>
    %cst_51 = arith.constant dense<0.000000e+00> : vector<1xf32>
    %111 = vector.multi_reduction <add>, %110, %cst_51 [1, 2] : vector<1x16x16xf32> to vector<1xf32>
    %112 = vector.shape_cast %111 : vector<1xf32> to vector<1x1x1xf32>
    %113 = vector.extract %112[0, 0, 0] : f32 from vector<1x1x1xf32>
    %cst_52 = arith.constant 3.906250e-03 : f32
    %114 = arith.mulf %113, %cst_52 : f32
    %cst_53 = arith.constant 9.99999974E-6 : f32
    %115 = arith.addf %114, %cst_53 : f32
    %cst_54 = arith.constant 0.000000e+00 : f32
    %116 = vector.broadcast %cst_54 : f32 to vector<16x16xf32>
    %117 = arith.mulf %11, %7 : vector<16x16xf32>
    %118 = vector.shape_cast %117 : vector<16x16xf32> to vector<1x16x16xf32>
    %cst_55 = arith.constant dense<0.000000e+00> : vector<1xf32>
    %119 = vector.multi_reduction <add>, %118, %cst_55 [1, 2] : vector<1x16x16xf32> to vector<1xf32>
    %120 = vector.shape_cast %119 : vector<1xf32> to vector<1x1x1xf32>
    %121 = vector.extract %120[0, 0, 0] : f32 from vector<1x1x1xf32>
    %cst_56 = arith.constant 3.906250e-03 : f32
    %122 = arith.mulf %121, %cst_56 : f32
    %123 = arith.divf %122, %115 : f32
    %124 = vector.broadcast %123 : f32 to vector<16x16xf32>
    %125 = arith.subf %11, %124 : vector<16x16xf32>
    %126 = arith.mulf %125, %125 : vector<16x16xf32>
    %127 = arith.addf %116, %126 : vector<16x16xf32>
    %128 = arith.mulf %13, %7 : vector<16x16xf32>
    %129 = vector.shape_cast %128 : vector<16x16xf32> to vector<1x16x16xf32>
    %cst_57 = arith.constant dense<0.000000e+00> : vector<1xf32>
    %130 = vector.multi_reduction <add>, %129, %cst_57 [1, 2] : vector<1x16x16xf32> to vector<1xf32>
    %131 = vector.shape_cast %130 : vector<1xf32> to vector<1x1x1xf32>
    %132 = vector.extract %131[0, 0, 0] : f32 from vector<1x1x1xf32>
    %cst_58 = arith.constant 3.906250e-03 : f32
    %133 = arith.mulf %132, %cst_58 : f32
    %134 = arith.divf %133, %115 : f32
    %135 = vector.broadcast %134 : f32 to vector<16x16xf32>
    %136 = arith.subf %13, %135 : vector<16x16xf32>
    %137 = arith.mulf %136, %136 : vector<16x16xf32>
    %138 = arith.addf %127, %137 : vector<16x16xf32>
    %139 = arith.mulf %15, %7 : vector<16x16xf32>
    %140 = vector.shape_cast %139 : vector<16x16xf32> to vector<1x16x16xf32>
    %cst_59 = arith.constant dense<0.000000e+00> : vector<1xf32>
    %141 = vector.multi_reduction <add>, %140, %cst_59 [1, 2] : vector<1x16x16xf32> to vector<1xf32>
    %142 = vector.shape_cast %141 : vector<1xf32> to vector<1x1x1xf32>
    %143 = vector.extract %142[0, 0, 0] : f32 from vector<1x1x1xf32>
    %cst_60 = arith.constant 3.906250e-03 : f32
    %144 = arith.mulf %143, %cst_60 : f32
    %145 = arith.divf %144, %115 : f32
    %146 = vector.broadcast %145 : f32 to vector<16x16xf32>
    %147 = arith.subf %15, %146 : vector<16x16xf32>
    %148 = arith.mulf %147, %147 : vector<16x16xf32>
    %149 = arith.addf %138, %148 : vector<16x16xf32>
    %150 = arith.mulf %149, %149 : vector<16x16xf32>
    %cst_61 = arith.constant 0.000000e+00 : f32
    %151 = vector.broadcast %cst_61 : f32 to vector<16x16xf32>
    %152 = arith.subf %151, %150 : vector<16x16xf32>
    %cst_62 = arith.constant 0.00999999977 : f32
    %153 = vector.broadcast %cst_62 : f32 to vector<16x16xf32>
    %154 = arith.mulf %152, %153 : vector<16x16xf32>
    %155 = math.exp %154 : vector<16x16xf32>
    %156 = arith.mulf %7, %155 : vector<16x16xf32>
    %157 = vector.shape_cast %9 : vector<16x16xf32> to vector<1x16x16xf32>
    %cst_63 = arith.constant dense<0.000000e+00> : vector<1xf32>
    %158 = vector.multi_reduction <add>, %157, %cst_63 [1, 2] : vector<1x16x16xf32> to vector<1xf32>
    %159 = vector.shape_cast %158 : vector<1xf32> to vector<1x1x1xf32>
    %160 = vector.extract %159[0, 0, 0] : f32 from vector<1x1x1xf32>
    %cst_64 = arith.constant 3.906250e-03 : f32
    %161 = arith.mulf %160, %cst_64 : f32
    %cst_65 = arith.constant 9.99999974E-6 : f32
    %162 = arith.addf %161, %cst_65 : f32
    %cst_66 = arith.constant 0.000000e+00 : f32
    %163 = vector.broadcast %cst_66 : f32 to vector<16x16xf32>
    %164 = arith.mulf %11, %9 : vector<16x16xf32>
    %165 = vector.shape_cast %164 : vector<16x16xf32> to vector<1x16x16xf32>
    %cst_67 = arith.constant dense<0.000000e+00> : vector<1xf32>
    %166 = vector.multi_reduction <add>, %165, %cst_67 [1, 2] : vector<1x16x16xf32> to vector<1xf32>
    %167 = vector.shape_cast %166 : vector<1xf32> to vector<1x1x1xf32>
    %168 = vector.extract %167[0, 0, 0] : f32 from vector<1x1x1xf32>
    %cst_68 = arith.constant 3.906250e-03 : f32
    %169 = arith.mulf %168, %cst_68 : f32
    %170 = arith.divf %169, %162 : f32
    %171 = vector.broadcast %170 : f32 to vector<16x16xf32>
    %172 = arith.subf %11, %171 : vector<16x16xf32>
    %173 = arith.mulf %172, %172 : vector<16x16xf32>
    %174 = arith.addf %163, %173 : vector<16x16xf32>
    %175 = arith.mulf %13, %9 : vector<16x16xf32>
    %176 = vector.shape_cast %175 : vector<16x16xf32> to vector<1x16x16xf32>
    %cst_69 = arith.constant dense<0.000000e+00> : vector<1xf32>
    %177 = vector.multi_reduction <add>, %176, %cst_69 [1, 2] : vector<1x16x16xf32> to vector<1xf32>
    %178 = vector.shape_cast %177 : vector<1xf32> to vector<1x1x1xf32>
    %179 = vector.extract %178[0, 0, 0] : f32 from vector<1x1x1xf32>
    %cst_70 = arith.constant 3.906250e-03 : f32
    %180 = arith.mulf %179, %cst_70 : f32
    %181 = arith.divf %180, %162 : f32
    %182 = vector.broadcast %181 : f32 to vector<16x16xf32>
    %183 = arith.subf %13, %182 : vector<16x16xf32>
    %184 = arith.mulf %183, %183 : vector<16x16xf32>
    %185 = arith.addf %174, %184 : vector<16x16xf32>
    %186 = arith.mulf %15, %9 : vector<16x16xf32>
    %187 = vector.shape_cast %186 : vector<16x16xf32> to vector<1x16x16xf32>
    %cst_71 = arith.constant dense<0.000000e+00> : vector<1xf32>
    %188 = vector.multi_reduction <add>, %187, %cst_71 [1, 2] : vector<1x16x16xf32> to vector<1xf32>
    %189 = vector.shape_cast %188 : vector<1xf32> to vector<1x1x1xf32>
    %190 = vector.extract %189[0, 0, 0] : f32 from vector<1x1x1xf32>
    %cst_72 = arith.constant 3.906250e-03 : f32
    %191 = arith.mulf %190, %cst_72 : f32
    %192 = arith.divf %191, %162 : f32
    %193 = vector.broadcast %192 : f32 to vector<16x16xf32>
    %194 = arith.subf %15, %193 : vector<16x16xf32>
    %195 = arith.mulf %194, %194 : vector<16x16xf32>
    %196 = arith.addf %185, %195 : vector<16x16xf32>
    %197 = arith.mulf %196, %196 : vector<16x16xf32>
    %cst_73 = arith.constant 0.000000e+00 : f32
    %198 = vector.broadcast %cst_73 : f32 to vector<16x16xf32>
    %199 = arith.subf %198, %197 : vector<16x16xf32>
    %cst_74 = arith.constant 0.00999999977 : f32
    %200 = vector.broadcast %cst_74 : f32 to vector<16x16xf32>
    %201 = arith.mulf %199, %200 : vector<16x16xf32>
    %202 = math.exp %201 : vector<16x16xf32>
    %203 = arith.mulf %9, %202 : vector<16x16xf32>
    %204 = tpu.concatenate %62, %109, %156, %203, %61, %108, %155, %202 in 0 : vector<16x16xf32>, vector<16x16xf32>, vector<16x16xf32>, vector<16x16xf32>, vector<16x16xf32>, vector<16x16xf32>, vector<16x16xf32>, vector<16x16xf32> -> vector<128x16xf32>
    %cst_75 = arith.constant dense<0.000000e+00> : vector<128x16xf32>
    %205 = tpu.matmul %204, %1, %cst_75 {dimension_numbers = #tpu.dot_dimension_numbers<[1], [0], [0], [1], [0, 0, 1, 1], [], []>} : vector<128x16xf32>, vector<16x16xf32>, vector<128x16xf32> -> vector<128x16xf32>
    %cst_76 = arith.constant dense<0.000000e+00> : vector<128x16xf32>
    %206 = tpu.matmul %0, %205, %cst_76 {dimension_numbers = #tpu.dot_dimension_numbers<[1], [0], [0], [1], [0, 0, 1, 1], [], []>} : vector<128x128xf32>, vector<128x16xf32>, vector<128x16xf32> -> vector<128x16xf32>
    %207 = vector.extract_strided_slice %206 {offsets = [0, 0], sizes = [16, 16], strides = [1, 1]} : vector<128x16xf32> to vector<16x16xf32>
    %208 = vector.extract_strided_slice %206 {offsets = [64, 0], sizes = [16, 16], strides = [1, 1]} : vector<128x16xf32> to vector<16x16xf32>
    %209 = arith.mulf %3, %207 : vector<16x16xf32>
    %210 = vector.shape_cast %209 : vector<16x16xf32> to vector<1x16x16xf32>
    %cst_77 = arith.constant dense<0.000000e+00> : vector<1xf32>
    %211 = vector.multi_reduction <add>, %210, %cst_77 [1, 2] : vector<1x16x16xf32> to vector<1xf32>
    %212 = vector.shape_cast %211 : vector<1xf32> to vector<1x1x1xf32>
    %213 = vector.extract %212[0, 0, 0] : f32 from vector<1x1x1xf32>
    %c0_78 = arith.constant 0 : index
    %214 = arith.index_cast %arg0 : i32 to index
    %215 = memref.load %arg5[%c0_78, %214] : memref<4x2xf32, #tpu.memory_space<smem>>
    memref.store %213, %arg5[%c0_78, %214] : memref<4x2xf32, #tpu.memory_space<smem>>
    %216 = arith.mulf %3, %208 : vector<16x16xf32>
    %217 = vector.shape_cast %216 : vector<16x16xf32> to vector<1x16x16xf32>
    %cst_79 = arith.constant dense<0.000000e+00> : vector<1xf32>
    %218 = vector.multi_reduction <add>, %217, %cst_79 [1, 2] : vector<1x16x16xf32> to vector<1xf32>
    %219 = vector.shape_cast %218 : vector<1xf32> to vector<1x1x1xf32>
    %220 = vector.extract %219[0, 0, 0] : f32 from vector<1x1x1xf32>
    %c0_80 = arith.constant 0 : index
    %221 = arith.index_cast %arg0 : i32 to index
    %222 = memref.load %arg6[%c0_80, %221] : memref<4x2xf32, #tpu.memory_space<smem>>
    memref.store %220, %arg6[%c0_80, %221] : memref<4x2xf32, #tpu.memory_space<smem>>
    %223 = vector.extract_strided_slice %206 {offsets = [16, 0], sizes = [16, 16], strides = [1, 1]} : vector<128x16xf32> to vector<16x16xf32>
    %224 = vector.extract_strided_slice %206 {offsets = [80, 0], sizes = [16, 16], strides = [1, 1]} : vector<128x16xf32> to vector<16x16xf32>
    %225 = arith.mulf %5, %223 : vector<16x16xf32>
    %226 = vector.shape_cast %225 : vector<16x16xf32> to vector<1x16x16xf32>
    %cst_81 = arith.constant dense<0.000000e+00> : vector<1xf32>
    %227 = vector.multi_reduction <add>, %226, %cst_81 [1, 2] : vector<1x16x16xf32> to vector<1xf32>
    %228 = vector.shape_cast %227 : vector<1xf32> to vector<1x1x1xf32>
    %229 = vector.extract %228[0, 0, 0] : f32 from vector<1x1x1xf32>
    %c1_82 = arith.constant 1 : index
    %230 = arith.index_cast %arg0 : i32 to index
    %231 = memref.load %arg5[%c1_82, %230] : memref<4x2xf32, #tpu.memory_space<smem>>
    memref.store %229, %arg5[%c1_82, %230] : memref<4x2xf32, #tpu.memory_space<smem>>
    %232 = arith.mulf %5, %224 : vector<16x16xf32>
    %233 = vector.shape_cast %232 : vector<16x16xf32> to vector<1x16x16xf32>
    %cst_83 = arith.constant dense<0.000000e+00> : vector<1xf32>
    %234 = vector.multi_reduction <add>, %233, %cst_83 [1, 2] : vector<1x16x16xf32> to vector<1xf32>
    %235 = vector.shape_cast %234 : vector<1xf32> to vector<1x1x1xf32>
    %236 = vector.extract %235[0, 0, 0] : f32 from vector<1x1x1xf32>
    %c1_84 = arith.constant 1 : index
    %237 = arith.index_cast %arg0 : i32 to index
    %238 = memref.load %arg6[%c1_84, %237] : memref<4x2xf32, #tpu.memory_space<smem>>
    memref.store %236, %arg6[%c1_84, %237] : memref<4x2xf32, #tpu.memory_space<smem>>
    %239 = vector.extract_strided_slice %206 {offsets = [32, 0], sizes = [16, 16], strides = [1, 1]} : vector<128x16xf32> to vector<16x16xf32>
    %240 = vector.extract_strided_slice %206 {offsets = [96, 0], sizes = [16, 16], strides = [1, 1]} : vector<128x16xf32> to vector<16x16xf32>
    %241 = arith.mulf %7, %239 : vector<16x16xf32>
    %242 = vector.shape_cast %241 : vector<16x16xf32> to vector<1x16x16xf32>
    %cst_85 = arith.constant dense<0.000000e+00> : vector<1xf32>
    %243 = vector.multi_reduction <add>, %242, %cst_85 [1, 2] : vector<1x16x16xf32> to vector<1xf32>
    %244 = vector.shape_cast %243 : vector<1xf32> to vector<1x1x1xf32>
    %245 = vector.extract %244[0, 0, 0] : f32 from vector<1x1x1xf32>
    %c2_86 = arith.constant 2 : index
    %246 = arith.index_cast %arg0 : i32 to index
    %247 = memref.load %arg5[%c2_86, %246] : memref<4x2xf32, #tpu.memory_space<smem>>
    memref.store %245, %arg5[%c2_86, %246] : memref<4x2xf32, #tpu.memory_space<smem>>
    %248 = arith.mulf %7, %240 : vector<16x16xf32>
    %249 = vector.shape_cast %248 : vector<16x16xf32> to vector<1x16x16xf32>
    %cst_87 = arith.constant dense<0.000000e+00> : vector<1xf32>
    %250 = vector.multi_reduction <add>, %249, %cst_87 [1, 2] : vector<1x16x16xf32> to vector<1xf32>
    %251 = vector.shape_cast %250 : vector<1xf32> to vector<1x1x1xf32>
    %252 = vector.extract %251[0, 0, 0] : f32 from vector<1x1x1xf32>
    %c2_88 = arith.constant 2 : index
    %253 = arith.index_cast %arg0 : i32 to index
    %254 = memref.load %arg6[%c2_88, %253] : memref<4x2xf32, #tpu.memory_space<smem>>
    memref.store %252, %arg6[%c2_88, %253] : memref<4x2xf32, #tpu.memory_space<smem>>
    %255 = vector.extract_strided_slice %206 {offsets = [48, 0], sizes = [16, 16], strides = [1, 1]} : vector<128x16xf32> to vector<16x16xf32>
    %256 = vector.extract_strided_slice %206 {offsets = [112, 0], sizes = [16, 16], strides = [1, 1]} : vector<128x16xf32> to vector<16x16xf32>
    %257 = arith.mulf %9, %255 : vector<16x16xf32>
    %258 = vector.shape_cast %257 : vector<16x16xf32> to vector<1x16x16xf32>
    %cst_89 = arith.constant dense<0.000000e+00> : vector<1xf32>
    %259 = vector.multi_reduction <add>, %258, %cst_89 [1, 2] : vector<1x16x16xf32> to vector<1xf32>
    %260 = vector.shape_cast %259 : vector<1xf32> to vector<1x1x1xf32>
    %261 = vector.extract %260[0, 0, 0] : f32 from vector<1x1x1xf32>
    %c3_90 = arith.constant 3 : index
    %262 = arith.index_cast %arg0 : i32 to index
    %263 = memref.load %arg5[%c3_90, %262] : memref<4x2xf32, #tpu.memory_space<smem>>
    memref.store %261, %arg5[%c3_90, %262] : memref<4x2xf32, #tpu.memory_space<smem>>
    %264 = arith.mulf %9, %256 : vector<16x16xf32>
    %265 = vector.shape_cast %264 : vector<16x16xf32> to vector<1x16x16xf32>
    %cst_91 = arith.constant dense<0.000000e+00> : vector<1xf32>
    %266 = vector.multi_reduction <add>, %265, %cst_91 [1, 2] : vector<1x16x16xf32> to vector<1xf32>
    %267 = vector.shape_cast %266 : vector<1xf32> to vector<1x1x1xf32>
    %268 = vector.extract %267[0, 0, 0] : f32 from vector<1x1x1xf32>
    %c3_92 = arith.constant 3 : index
    %269 = arith.index_cast %arg0 : i32 to index
    %270 = memref.load %arg6[%c3_92, %269] : memref<4x2xf32, #tpu.memory_space<smem>>
    memref.store %268, %arg6[%c3_92, %269] : memref<4x2xf32, #tpu.memory_space<smem>>
    return
  }
  func.func @transform_0(%arg0: i32) -> (i32, i32, i32, i32) {
    %c0_i32 = arith.constant 0 : i32
    %c0_i32_0 = arith.constant 0 : i32
    %c0_i32_1 = arith.constant 0 : i32
    %c0_i32_2 = arith.constant 0 : i32
    return %arg0, %c0_i32, %c0_i32_0, %c0_i32_1 : i32, i32, i32, i32
  }
  func.func @transform_1(%arg0: i32) -> (i32, i32, i32, i32) {
    %c0_i32 = arith.constant 0 : i32
    %c0_i32_0 = arith.constant 0 : i32
    %c0_i32_1 = arith.constant 0 : i32
    %c0_i32_2 = arith.constant 0 : i32
    return %arg0, %c0_i32, %c0_i32_0, %c0_i32_1 : i32, i32, i32, i32
  }
  func.func @transform_2(%arg0: i32) -> (i32, i32) {
    %c0_i32 = arith.constant 0 : i32
    %c0_i32_0 = arith.constant 0 : i32
    %c0_i32_1 = arith.constant 0 : i32
    return %c0_i32, %c0_i32_0 : i32, i32
  }
  func.func @transform_3(%arg0: i32) -> (i32, i32) {
    %c0_i32 = arith.constant 0 : i32
    %c0_i32_0 = arith.constant 0 : i32
    %c0_i32_1 = arith.constant 0 : i32
    return %c0_i32, %c0_i32_0 : i32, i32
  }
  func.func @transform_4(%arg0: i32) -> (i32, i32) {
    %c0_i32 = arith.constant 0 : i32
    %c0_i32_0 = arith.constant 0 : i32
    %c0_i32_1 = arith.constant 0 : i32
    return %c0_i32, %c0_i32_0 : i32, i32
  }
  func.func @transform_5(%arg0: i32) -> (i32, i32) {
    %c0_i32 = arith.constant 0 : i32
    %c0_i32_0 = arith.constant 0 : i32
    %c0_i32_1 = arith.constant 0 : i32
    return %c0_i32, %c0_i32_0 : i32, i32
  }
}

</mosaic_0001>

<bundles_post_ra>
// kernel: tpu_custom_call.1
= control target key start
LH: loop header
LB: loop body
LE: loop exit
PB: predicated region body
PF: predicated region fallthrough
CT: control target
= control target key end

     0   :  { %11 = vsyncpa [#allocation3], 0  ;;  %s2516_s0 = inlined_call_operand.hbm [shape: f32[2,4,16,16], index: 0, kind: input, shape index: {}]   ;;  %s2517_s1 = inlined_call_operand.hbm [shape: f32[2,3,16,16], index: 1, kind: input, shape index: {}]   ;;  %s2518_s2 = inlined_call_operand.hbm [shape: f32[128,128], index: 2, kind: input, shape index: {}]   ;;  %s2519_s3 = inlined_call_operand.hbm [shape: f32[16,16], index: 3, kind: input, shape index: {}]   ;;  %s2520_s4 = inlined_call_operand.vmem [shape: f32[4,2], index: 4, kind: output, shape index: {0}]   ;;  %s2521_s5 = inlined_call_operand.vmem [shape: f32[4,2], index: 5, kind: output, shape index: {1}]  }
   0x1   :  { %13 = vsyncpa [#allocation3 + $0x1], 0 }
   0x2   :  { %14 = vsyncpa [#allocation6], 0 }
   0x3   :  { %16 = vsyncpa [#allocation6 + $0x1], 0 }
   0x4   :  { %17 = vsyncpa [#allocation9], 0 }
   0x5   :  { %18 = vsyncpa [#allocation4], 0 }
   0x6   :  { %19 = vsyncpa [#allocation12], 0  ;;  %s2034_s18 = smov 0   ;;  %s2036_s19 = smov 0  }
   0x7   :  { %s2038_s20 = smov 0   ;;  %s2040_s21 = smov 0  }
   0x8 LB: > { %s2053_s22 = sadd.s32 4294967295, %s1994_s21   ;;  %p45_p0 = scmp.ne.s32.totalorder %s1986_s19, %s1982_s18  ;;  %s1994_s21 = sphi %s2040_s21, %s2538_s21   ;;  %s1990_s20 = sphi %s2038_s20, %s2537_s20   ;;  %s1986_s19 = sphi %s2036_s19, %s2536_s19   ;;  %s1982_s18 = sphi %s2034_s18, %s2535_s18  }
   0x9   : > { %p2522_p1 = scmp.eq.s32.totalorder %s2053_s22, 0  ;;  %p1381_p2 = scmp.ge.s32.totalorder %s1994_s21, 1 }
   0xa   : > { %p166_p3 = scmp.lt.s32.totalorder %s1994_s21, 3  ;;  %s1996_s25 = smov [#allocation7]  }
   0xb   : > { %p2061_p4 = por %p2522_p1, %p45_p0  ;;  %s178_s26 = sshll.u32 %s1996_s25, 4  ;;  %s179_s26 = int_to_ptr.vmem [resolvable:$true] %s178_s26 }
   0xc   : > { %p2065_p5 = pnand %p1381_p2, %p166_p3  ;;  %s1997_s28 = smov [#allocation8]  }
   0xd   : > { %s2525_s23 = scalar_select %p2061_p4, 1, 0 }
   0xe   : > { %s2526_s24 = scalar_select %p2065_p5, 1, 0 }
   0xf   : > { %p1703_p6 = pneg %p2065_p5  ;;  %s191_s29 = sshll.u32 %s1997_s28, 4  ;;  %s2077_s29 = int_to_ptr.vmem [resolvable:$true] %s191_s29 }
  0x10   : > { %s1796_s7 = scalar_lea.hbm %s2518_s2, 2048 }
  0x11   : > { %p2073_p7 = pnand %p1703_p6, %p2522_p1  ;;  %p1797_p8 = scmp.ne.s32.totalorder %s2518_s2, %s1796_s7 }
  0x12   : > { %p1803_p12 = scmp.lt.u32.totalorder %s1796_s7, %s2518_s2 }
  0x13   : > { %p1798_p9 = pneg %p2073_p7 }
  0x15   : > { %p1799_p10 = pnand %p1798_p9, %p1797_p8 }
  0x17   : > { %p1800_p11 = pneg %p1799_p10 }
  0x19   : > { %p1805_p13 = pnand %p1803_p12, %p1800_p11 }
  0x1b   : > { %1808 = shalt.err (!%p1805_p13)
}
  0x1c   : > { %s1809_s12 = scalar_lea.vmem %s179_s26, 2048  ;;  %p1817_p6 = scmp.lt.s32.totalorder %s179_s26, %s179_s26 }
  0x1d   : > { %p1810_p0 = scmp.ne.s32.totalorder %s179_s26, %s1809_s12  ;;  %p1818_p1 = scmp.lt.s32.totalorder %s1809_s12, %s1809_s12 }
  0x1f   : > { %p1812_p2 = pnand %p1810_p0, %p1798_p9  ;;  %p1819_p4 = por %p1818_p1, %p1817_p6 }
  0x21   : > { %p1813_p3 = pneg %p1812_p2 }
  0x23   : > { %p1820_p5 = pnand %p1819_p4, %p1813_p3 }
  0x25   : > { %1823 = shalt.err (!%p1820_p5)
}
  0x26   : > { %s1998_s13 = smov 128   ;;  %s1999_s14 = smov 8  }
  0x27   : > { %1706 = dma.hbm_to_vmem [thread:$0]  (!%p2073_p7), %s2518_s2, 2048, %s179_s26, [#allocation6], %s1998_s13, %s1998_s13, %s1999_s14  }
  0x28   : > { %s1824_s25 = scalar_lea.hbm %s2519_s3, 256 }
  0x29   : > { %p1825_p1 = scmp.ne.s32.totalorder %s2519_s3, %s1824_s25  ;;  %p1831_p8 = scmp.lt.u32.totalorder %s1824_s25, %s2519_s3 }
  0x2b   : > { %p1827_p4 = pnand %p1825_p1, %p1798_p9 }
  0x2d   : > { %p1828_p5 = pneg %p1827_p4 }
  0x2f   : > { %p1833_p10 = pnand %p1831_p8, %p1828_p5 }
  0x31   : > { %1836 = shalt.err (!%p1833_p10)
}
  0x32   : > { %s1837_s26 = scalar_lea.vmem %s2077_s29, 256  ;;  %p1845_p0 = scmp.lt.s32.totalorder %s2077_s29, %s2077_s29 }
  0x33   : > { %p1838_p11 = scmp.ne.s32.totalorder %s2077_s29, %s1837_s26  ;;  %p1846_p2 = scmp.lt.s32.totalorder %s1837_s26, %s1837_s26 }
  0x35   : > { %p1840_p12 = pnand %p1838_p11, %p1798_p9  ;;  %p1847_p3 = por %p1846_p2, %p1845_p0 }
  0x37   : > { %p1841_p13 = pneg %p1840_p12 }
  0x39   : > { %p1848_p6 = pnand %p1847_p3, %p1841_p13 }
  0x3b   : > { %1851 = shalt.err (!%p1848_p6)
}
  0x3c   : > { %1709 = dma.hbm_to_vmem [thread:$0]  (!%p2073_p7), %s2519_s3, 256, %s2077_s29, [#allocation9], %s1998_s13, %s1998_s13, %s1999_s14  }
  0x3d   : > { %s2133_s10 = sadd.s32 1, %s1994_s21   ;;  %s32_s27 = sadd.s32 1, %s1990_s20 }
  0x3e   : > { %s29_s11 = ssub.s32 %s1994_s21, %s2133_s10  ;;  %p39_p9 = scmp.ne.s32.totalorder %s1990_s20, %s1986_s19 }
  0x3f   : > { %p30_p1 = scmp.eq.s32.totalorder %s29_s11, 0  ;;  %p40_p4 = scmp.eq.s32.totalorder %s1994_s21, 0 }
  0x40   : > { %p1719_p5 = scmp.lt.s32.totalorder %s1994_s21, 2  ;;  %s2143_s12 = sand.u32 1, %s1990_s20  }
  0x41   : > { %s2146_s15 = scalar_select %p30_p1, %s1990_s20, %s32_s27  }
  0x42   : > { %p41_p8 = por %p40_p4, %p39_p9  ;;  %s1385_s16 = sshll.u32 %s2143_s12, 6 }
  0x43   : > { %s1433_s17 = sshll.u32 %s1994_s21, 10  ;;  %s209_s28 = scalar_lea.vmem [#allocation2], %s1385_s16 }
  0x44   : > { %s2153_s25 = scalar_lea.hbm %s2516_s0, %s1433_s17  ;;  %s216_s30 = sshll.u32 %s209_s28, 4  ;;  %s2159_s30 = int_to_ptr.vmem [resolvable:$true] %s216_s30 }
  0x45   : > { %p2155_p7 = pnand %p1719_p5, %p41_p8  ;;  %s226_s7 = sand.u32 1, %s1994_s21  }
  0x46   : > { %s206_s26 = scalar_lea.sflag [#allocation3], %s2143_s12  ;;  %s1852_s8 = scalar_lea.hbm %s2153_s25, 1024 }
  0x47   : > { %p1853_p10 = scmp.ne.s32.totalorder %s2153_s25, %s1852_s8  ;;  %p1854_p11 = pneg %p2155_p7 }
  0x48   : > { %s1857_s11 = scalar_lea.hbm %s2516_s0, 2048  ;;  %p1858_p0 = scmp.lt.u32.totalorder %s2153_s25, %s2516_s0 }
  0x49   : > { %p1855_p12 = pnand %p1854_p11, %p1853_p10  ;;  %p1859_p2 = scmp.lt.u32.totalorder %s1857_s11, %s1852_s8 }
  0x4a   : > { %p1861_p6 = scmp.lt.u32.totalorder %s1852_s8, %s2153_s25 }
  0x4b   : > { %p1856_p13 = pneg %p1855_p12  ;;  %p1860_p3 = por %p1859_p2, %p1858_p0 }
  0x4d   : > { %p1862_p9 = por %p1861_p6, %p1860_p3 }
  0x4f   : > { %p1863_p1 = pnand %p1862_p9, %p1856_p13 }
  0x51   : > { %1866 = shalt.err (!%p1863_p1)
}
  0x52   : > { %s1867_s29 = scalar_lea.vmem %s2159_s30, 1024  ;;  %s2000_s18 = smov [#allocation2]  }
  0x53   : > { %p1868_p4 = scmp.ne.s32.totalorder %s2159_s30, %s1867_s29  ;;  %s1872_s28 = sshll.u32 %s2000_s18, 4  ;;  %s1873_s28 = int_to_ptr.vmem [resolvable:$false] %s1872_s28 }
  0x54   : > { %s1874_s9 = scalar_lea.vmem %s1873_s28, 2048  ;;  %p1875_p10 = scmp.lt.s32.totalorder %s2159_s30, %s1873_s28 }
  0x55   : > { %p1870_p5 = pnand %p1868_p4, %p1854_p11  ;;  %p1876_p12 = scmp.lt.s32.totalorder %s1874_s9, %s1867_s29 }
  0x57   : > { %p1871_p8 = pneg %p1870_p5  ;;  %p1877_p0 = por %p1876_p12, %p1875_p10 }
  0x59   : > { %p1878_p2 = pnand %p1877_p0, %p1871_p8 }
  0x5b   : > { %1881 = shalt.err (!%p1878_p2)
}
  0x5c   : > { %1713 = dma.hbm_to_vmem [thread:$0]  (!%p2155_p7), %s2153_s25, 1024, %s2159_s30, %s206_s26, %s1998_s13, %s1998_s13, %s1999_s14  }
  0x5d   : > { %s1624_s8 = smul.u32 48, %s2143_s12  ;;  %s2204_s28 = scalar_lea.sflag [#allocation6], %s226_s7 }
  0x5e   : > { %s1625_s27 = smul.u32 768, %s1994_s21  ;;  %s1887_s30 = scalar_lea.hbm %s2517_s1, 1536 }
  0x5f   : > { %s230_s29 = scalar_lea.vmem [#allocation5], %s1624_s8 }
  0x60   : > { %s2198_s17 = scalar_lea.hbm %s2517_s1, %s1625_s27  ;;  %s237_s18 = sshll.u32 %s230_s29, 4  ;;  %s2200_s18 = int_to_ptr.vmem [resolvable:$true] %s237_s18 }
  0x61   : > { %s1882_s9 = scalar_lea.hbm %s2198_s17, 768  ;;  %p1888_p9 = scmp.lt.u32.totalorder %s2198_s17, %s2517_s1 }
  0x62   : > { %p1883_p13 = scmp.ne.s32.totalorder %s2198_s17, %s1882_s9  ;;  %p1889_p1 = scmp.lt.u32.totalorder %s1887_s30, %s1882_s9 }
  0x63   : > { %p1891_p5 = scmp.lt.u32.totalorder %s1882_s9, %s2198_s17 }
  0x64   : > { %p1885_p3 = pnand %p1883_p13, %p1854_p11  ;;  %p1890_p4 = por %p1889_p1, %p1888_p9 }
  0x66   : > { %p1886_p6 = pneg %p1885_p3  ;;  %p1892_p8 = por %p1891_p5, %p1890_p4 }
  0x68   : > { %p1893_p10 = pnand %p1892_p8, %p1886_p6 }
  0x6a   : > { %1896 = shalt.err (!%p1893_p10)
}
  0x6b   : > { %s1897_s7 = scalar_lea.vmem %s2200_s18, 768  ;;  %s2001_s8 = smov [#allocation5]  }
  0x6c   : > { %p1898_p12 = scmp.ne.s32.totalorder %s2200_s18, %s1897_s7  ;;  %s1902_s11 = sshll.u32 %s2001_s8, 4  ;;  %s1903_s11 = int_to_ptr.vmem [resolvable:$false] %s1902_s11 }
  0x6d   : > { %s1904_s16 = scalar_lea.vmem %s1903_s11, 1536  ;;  %p1905_p13 = scmp.lt.s32.totalorder %s2200_s18, %s1903_s11 }
  0x6e   : > { %p1900_p0 = pnand %p1898_p12, %p1854_p11  ;;  %p1906_p3 = scmp.lt.s32.totalorder %s1904_s16, %s1897_s7 }
  0x70   : > { %p1901_p2 = pneg %p1900_p0  ;;  %p1907_p9 = por %p1906_p3, %p1905_p13 }
  0x72   : > { %p1908_p1 = pnand %p1907_p9, %p1901_p2 }
  0x74   : > { %1911 = shalt.err (!%p1908_p1)
}
  0x75   : > { %1716 = dma.hbm_to_vmem [thread:$0]  (!%p2155_p7), %s2198_s17, 768, %s2200_s18, %s2204_s28, %s1998_s13, %s1998_s13, %s1999_s14  }
  0x76   : > { %p2529_p11 = scmp.ne.s32.totalorder %s2526_s24, 0 }
  0x77   : > { %s251_s29 = sand.u32 (!%p2529_p11), 1, %s1986_s19   ;;  %p2530_p6 = scmp.ne.s32.totalorder (!%p2529_p11), %s2525_s23, 0 }
  0x78   : > { %249 = sbr.rel (%p2529_p11) target bundleno = 1353 (0x549), region = 36  ;;  %s1390_s9 = sshll.u32 (!%p2529_p11), %s251_s29, 6 }
  0x79   : > { %s252_s12 = scalar_lea.sflag (!%p2529_p11), [#allocation3], %s251_s29  ;;  %s2236_s25 = scalar_lea.vmem (!%p2529_p11), [#allocation2], %s1390_s9 }
  0x7f   : > { %1957 = dma.done.wait (%p2530_p6), %s252_s12, 1024  }
  0x80   : > { %1959 = vsyncadd (%p2530_p6), %s252_s12, 4294966272  ;;  %s260_s6 = sand.u32 1, %s2053_s22   ;;  %s1626_s30 = smul.u32 48, %s251_s29 }
  0x81   : > { %s261_s13 = scalar_lea.sflag [#allocation6], %s260_s6 }
  0x82   : > { %s264_s14 = scalar_lea.vmem [#allocation5], %s1626_s30 }
  0x83   : > { %1961 = dma.done.wait (%p2530_p6), %s261_s13, 768  }
  0x84   : > { %1963 = vsyncadd (%p2530_p6), %s261_s13, 4294966528  ;;  %p2531_p7 = scmp.eq.s32.totalorder %s2053_s22, 0 }
  0x86   : > { %1965 = dma.done.wait (%p2531_p7), [#allocation6], 2048   ;;  %p2532_p4 = pmov %p2531_p7 }
  0x88   : > { %1967 = vsyncadd (%p2532_p4), [#allocation6], 4294965248  ;;  %p2533_p5 = pmov %p2532_p4 }
  0x89   : > { %p2534_p8 = pmov %p2532_p4 }
  0x8a   : > { %1969 = dma.done.wait (%p2533_p5), [#allocation9], 256  }
  0x8b   : > { %1971 = vsyncadd (%p2534_p8), [#allocation9], 4294967040  ;;  %vm336_vm0 = vcmask 130048   ;;  %v2256_v0 = vld [vmem:[%s2236_s25] sm:$0xff]  ;;  %v2259_v1 = vld [vmem:[%s2236_s25 + $0x8] sm:$0xff]  ;;  %p1722_p10 = scmp.eq.s32.totalorder %s2053_s22, 1 }
  0x8c   : > { %v2261_v2 = vld [vmem:[%s264_s14 + $0x10] sm:$0xff]  ;;  %v337_v3 = vsel %vm336_vm0, %v2256_v0, 0.0  ;;  %v338_v4 = vsel %vm336_vm0, %v2259_v1, 0.0  ;;  %v2267_v5 = vld [vmem:[%s264_s14 + $0x18] sm:$0xff]  ;;  %v2271_v7 = vld [vmem:[%s264_s14] sm:$0xff] }
  0x8d   : > { %v377_v6 = vmul.f32 %v2261_v2, %v2256_v0  ;;  %v2273_v8 = vld [vmem:[%s264_s14 + $0x8] sm:$0xff]  ;;  %v339_v9 = vadd.f32 %v338_v4, %v337_v3  ;;  %v378_v10 = vmul.f32 %v2267_v5, %v2259_v1  ;;  %v351_v11 = vmul.f32 %v2271_v7, %v2256_v0  ;;  %v2281_v13 = vld [vmem:[%s264_s14 + $0x20] sm:$0xff] }
  0x8e   : > { %v352_v12 = vmul.f32 %v2273_v8, %v2259_v1  ;;  %v2283_v14 = vld [vmem:[%s264_s14 + $0x28] sm:$0xff]  ;;  %v2286_v15 = vld [vmem:[%s2236_s25 + $0x10] sm:$0xff]  ;;  %v403_v17 = vmul.f32 %v2281_v13, %v2256_v0  ;;  %v2322_v41 = vld [vmem:[%s2236_s25 + $0x20] sm:$0xff] }
  0x8f   : > { %v379_v16 = vsel %vm336_vm0, %v377_v6, 0.0  ;;  %v404_v18 = vmul.f32 %v2283_v14, %v2259_v1  ;;  %v2294_v19 = vld [vmem:[%s2236_s25 + $0x18] sm:$0xff]  ;;  %v441_v20 = vsel %vm336_vm0, %v2286_v15, 0.0  ;;  %340 = vadd.xlane.f32.xlu0 %v339_v9  ;;  %v380_v21 = vsel %vm336_vm0, %v378_v10, 0.0  ;;  %v2325_v42 = vld [vmem:[%s2236_s25 + $0x28] sm:$0xff]  ;;  %v2342_v55 = vld [vmem:[%s2236_s25 + $0x30] sm:$0xff] }
  0x90   : > { %v353_v22 = vsel %vm336_vm0, %v351_v11, 0.0  ;;  %v354_v23 = vsel %vm336_vm0, %v352_v12, 0.0  ;;  %v442_v24 = vsel %vm336_vm0, %v2294_v19, 0.0  ;;  %v381_v25 = vadd.f32 %v380_v21, %v379_v16  ;;  %v2345_v56 = vld [vmem:[%s2236_s25 + $0x38] sm:$0xff] }
  0x91   : > { %v355_v26 = vadd.f32 %v354_v23, %v353_v22  ;;  %v405_v27 = vsel %vm336_vm0, %v403_v17, 0.0  ;;  %v406_v28 = vsel %vm336_vm0, %v404_v18, 0.0  ;;  %v455_v29 = vmul.f32 %v2286_v15, %v2271_v7 }
  0x92   : > { %v456_v30 = vmul.f32 %v2294_v19, %v2273_v8  ;;  %382 = vadd.xlane.f32.xlu1 %v381_v25  ;;  %v407_v31 = vadd.f32 %v406_v28, %v405_v27  ;;  %v443_v32 = vadd.f32 %v442_v24, %v441_v20  ;;  %v481_v33 = vmul.f32 %v2261_v2, %v2286_v15 }
  0x93   : > { %v482_v34 = vmul.f32 %v2267_v5, %v2294_v19  ;;  %356 = vadd.xlane.f32.xlu0 %v355_v26  ;;  %v457_v35 = vsel %vm336_vm0, %v455_v29, 0.0  ;;  %v507_v37 = vmul.f32 %v2281_v13, %v2286_v15  ;;  %v508_v38 = vmul.f32 %v2283_v14, %v2294_v19 }
  0x94   : > { %v458_v36 = vsel %vm336_vm0, %v456_v30, 0.0  ;;  %v483_v39 = vsel %vm336_vm0, %v481_v33, 0.0  ;;  %v545_v47 = vsel %vm336_vm0, %v2322_v41, 0.0  ;;  %v546_v48 = vsel %vm336_vm0, %v2325_v42, 0.0 }
  0x95   : > { %v484_v40 = vsel %vm336_vm0, %v482_v34, 0.0  ;;  %v459_v43 = vadd.f32 %v458_v36, %v457_v35  ;;  %v509_v45 = vsel %vm336_vm0, %v507_v37, 0.0  ;;  %v510_v46 = vsel %vm336_vm0, %v508_v38, 0.0 }
  0x96   : > { %408 = vadd.xlane.f32.xlu1 %v407_v31  ;;  %v485_v44 = vadd.f32 %v484_v40, %v483_v39  ;;  %v511_v49 = vadd.f32 %v510_v46, %v509_v45  ;;  %v547_v50 = vadd.f32 %v546_v48, %v545_v47  ;;  %v559_v51 = vmul.f32 %v2322_v41, %v2271_v7  ;;  %v315_v48 = vld [vmem:[#allocation8] sm:$0xff] }
  0x97   : > { %444 = vadd.xlane.f32.xlu0 %v443_v32  ;;  %v560_v52 = vmul.f32 %v2325_v42, %v2273_v8  ;;  %v585_v53 = vmul.f32 %v2261_v2, %v2322_v41  ;;  %v586_v54 = vmul.f32 %v2267_v5, %v2325_v42  ;;  %v611_v57 = vmul.f32 %v2281_v13, %v2322_v41 }
  0x98   : > { %v612_v58 = vmul.f32 %v2283_v14, %v2325_v42  ;;  %v649_v59 = vsel %vm336_vm0, %v2342_v55, 0.0  ;;  %v650_v60 = vsel %vm336_vm0, %v2345_v56, 0.0  ;;  %v561_v61 = vsel %vm336_vm0, %v559_v51, 0.0 }
  0x99   : > { %v562_v62 = vsel %vm336_vm0, %v560_v52, 0.0  ;;  %v587_v63 = vsel %vm336_vm0, %v585_v53, 0.0  ;;  %v588_v3 = vsel %vm336_vm0, %v586_v54, 0.0  ;;  %v613_v9 = vsel %vm336_vm0, %v611_v57, 0.0 }
  0x9a   : > { %460 = vadd.xlane.f32.xlu1 %v459_v43  ;;  %v563_v4 = vadd.f32 %v562_v62, %v561_v61  ;;  %v589_v6 = vadd.f32 %v588_v3, %v587_v63  ;;  %v614_v10 = vsel %vm336_vm0, %v612_v58, 0.0  ;;  %v651_v12 = vadd.f32 %v650_v60, %v649_v59 }
  0x9b   : > { %486 = vadd.xlane.f32.xlu0 %v485_v44  ;;  %v615_v11 = vadd.f32 %v614_v10, %v613_v9  ;;  %v663_v16 = vmul.f32 %v2342_v55, %v2271_v7  ;;  %v664_v17 = vmul.f32 %v2345_v56, %v2273_v8  ;;  %v689_v18 = vmul.f32 %v2261_v2, %v2342_v55 }
  0x9c   : > { %v690_v20 = vmul.f32 %v2267_v5, %v2345_v56  ;;  %v715_v21 = vmul.f32 %v2281_v13, %v2342_v55  ;;  %v716_v22 = vmul.f32 %v2283_v14, %v2345_v56 }
  0x9d   : > { %v665_v23 = vsel %vm336_vm0, %v663_v16, 0.0  ;;  %v666_v24 = vsel %vm336_vm0, %v664_v17, 0.0  ;;  %v691_v25 = vsel %vm336_vm0, %v689_v18, 0.0 }
  0x9e   : > { %512 = vadd.xlane.f32.xlu1 %v511_v49  ;;  %v692_v26 = vsel %vm336_vm0, %v690_v20, 0.0  ;;  %v667_v27 = vadd.f32 %v666_v24, %v665_v23  ;;  %v717_v29 = vsel %vm336_vm0, %v715_v21, 0.0  ;;  %v718_v30 = vsel %vm336_vm0, %v716_v22, 0.0  ;;  %v316_v49 = vld [vmem:[#allocation8 + $0x8] sm:$0xff] }
  0x9f   : > { %548 = vadd.xlane.f32.xlu0 %v547_v50  ;;  %v693_v28 = vadd.f32 %v692_v26, %v691_v25  ;;  %v719_v31 = vadd.f32 %v718_v30, %v717_v29  ;;  %v1572_v50 = vpack.c.bf16 %v316_v49, %v315_v48 }
  0xa1   : > { %1573 = vmatprep.subr.bf16.mxu0 %v1572_v50 }
  0xa2   : > { %564 = vadd.xlane.f32.xlu1 %v563_v4  ;;  %1575 = vmatpush3.bf16.msra.mxu0 %v1572_v50 }
  0xa3   : > { %590 = vadd.xlane.f32.xlu0 %v589_v6 }
  0xa6   : > { %616 = vadd.xlane.f32.xlu1 %v615_v11 }
  0xa7   : > { %652 = vadd.xlane.f32.xlu0 %v651_v12 }
  0xaa   : > { %668 = vadd.xlane.f32.xlu1 %v667_v27 }
  0xab   : > { %694 = vadd.xlane.f32.xlu0 %v693_v28 }
  0xae   : > { %720 = vadd.xlane.f32.xlu1 %v719_v31 }
 0x11c   : > { %v341_v32 = vpop.xlane.xlu0 %340 }
 0x11d   : > { %v342_v33 = vrot.slane %v341_v32, 4 }
 0x11f   : > { %v343_v34 = vadd.f32 %v342_v33, %v341_v32  ;;  %v383_v51 = vpop.xlane.xlu1 %382 }
 0x120   : > { %v357_v35 = vpop.xlane.xlu0 %356  ;;  %v384_v57 = vrot.slane %v383_v51, 4 }
 0x121   : > { %v344_v36 = vrot.slane %v343_v34, 2  ;;  %v358_v37 = vrot.slane %v357_v35, 4 }
 0x122   : > { %v385_v61 = vadd.f32 %v384_v57, %v383_v51 }
 0x123   : > { %v345_v38 = vadd.f32 %v344_v36, %v343_v34  ;;  %v359_v39 = vadd.f32 %v358_v37, %v357_v35  ;;  %v409_v52 = vpop.xlane.xlu1 %408 }
 0x124   : > { %v445_v54 = vpop.xlane.xlu0 %444  ;;  %v410_v58 = vrot.slane %v409_v52, 4  ;;  %v386_v4 = vrot.slane %v385_v61, 2 }
 0x125   : > { %v346_v40 = vrot.slane %v345_v38, 1  ;;  %v360_v43 = vrot.slane %v359_v39, 2  ;;  %v446_v60 = vrot.slane %v445_v54, 4 }
 0x126   : > { %v411_v62 = vadd.f32 %v410_v58, %v409_v52  ;;  %v387_v12 = vadd.f32 %v386_v4, %v385_v61 }
 0x127   : > { %v347_v44 = vadd.f32 %v346_v40, %v345_v38  ;;  %v361_v45 = vadd.f32 %v360_v43, %v359_v39  ;;  %v461_v53 = vpop.xlane.xlu1 %460  ;;  %v447_v3 = vadd.f32 %v446_v60, %v445_v54 }
 0x128   : > { %v462_v59 = vrot.slane %v461_v53, 4  ;;  %v412_v6 = vrot.slane %v411_v62, 2  ;;  %v388_v20 = vrot.slane %v387_v12, 1  ;;  %v487_v29 = vpop.xlane.xlu0 %486 }
 0x129   : > { %1627 = vpush %v347_v44  ;;  %v362_v46 = vrot.slane %v361_v45, 1  ;;  %v448_v11 = vrot.slane %v447_v3, 2  ;;  %v488_v33 = vrot.slane %v487_v29, 4 }
 0x12a   : > { %v463_v63 = vadd.f32 %v462_v59, %v461_v53  ;;  %v413_v16 = vadd.f32 %v412_v6, %v411_v62  ;;  %v389_v25 = vadd.f32 %v388_v20, %v387_v12 }
 0x12b   : > { %v363_v47 = vadd.f32 %v362_v46, %v361_v45  ;;  %v449_v18 = vadd.f32 %v448_v11, %v447_v3  ;;  %v513_v30 = vpop.xlane.xlu1 %512  ;;  %v489_v38 = vadd.f32 %v488_v33, %v487_v29 }
 0x12c   : > { %v464_v10 = vrot.slane %v463_v63, 2  ;;  %v414_v21 = vrot.slane %v413_v16, 1  ;;  %v549_v31 = vpop.xlane.xlu0 %548  ;;  %v514_v34 = vrot.slane %v513_v30, 4 }
 0x12d   : > { %1629 = vpush %v363_v47  ;;  %v450_v23 = vrot.slane %v449_v18, 1  ;;  %v550_v35 = vrot.slane %v549_v31, 4  ;;  %v490_v50 = vrot.slane %v489_v38, 2 }
 0x12e   : > { %v465_v17 = vadd.f32 %v464_v10, %v463_v63  ;;  %v415_v26 = vadd.f32 %v414_v21, %v413_v16  ;;  %v515_v39 = vadd.f32 %v514_v34, %v513_v30 }
 0x12f   : > { %v451_v28 = vadd.f32 %v450_v23, %v449_v18  ;;  %v565_v32 = vpop.xlane.xlu1 %564  ;;  %v551_v44 = vadd.f32 %v550_v35, %v549_v31  ;;  %v491_v11 = vadd.f32 %v490_v50, %v489_v38 }
 0x130   : > { %v466_v22 = vrot.slane %v465_v17, 1  ;;  %v566_v36 = vrot.slane %v565_v32, 4  ;;  %v516_v51 = vrot.slane %v515_v39, 2 }
 0x131   : > { %v552_v60 = vrot.slane %v551_v44, 2  ;;  %v492_v23 = vrot.slane %v491_v11, 1 }
 0x132   : > { %v467_v27 = vadd.f32 %v466_v22, %v465_v17  ;;  %v567_v46 = vadd.f32 %v566_v36, %v565_v32  ;;  %v517_v12 = vadd.f32 %v516_v51, %v515_v39 }
 0x133   : > { %v553_v20 = vadd.f32 %v552_v60, %v551_v44  ;;  %v493_v32 = vadd.f32 %v492_v23, %v491_v11 }
 0x134   : > { %v568_v63 = vrot.slane %v567_v46, 2 }
 0x136   : > { %v569_v16 = vadd.f32 %v568_v63, %v567_v46 }
 0x15a   : > { %s1628_s23 = spop %1627 }
 0x15b   : > { %s349_s24 = smul.f32 0.00390625, %s1628_s23 }
 0x15d   : > { %s350_s17 = sadd.f32 1e-05, %s349_s24 }
 0x15e   : > { %s1630_s18 = spop %1629 }
 0x15f   : > { %v366_v9 = vstv %s350_s17  ;;  %s365_s28 = smul.f32 0.00390625, %s1630_s18 }
 0x160   : > { %1764 = vrcp.f32 %v366_v9 }
 0x16a   : > { %v1765_v24 = vpop.eup %1764 }
 0x16b   : > { %1631 = vpush %v1765_v24  ;;  %v518_v24 = vrot.slane %v517_v12, 1 }
 0x16c   : > { %1633 = vpush %v389_v25  ;;  %v570_v25 = vrot.slane %v569_v16, 1 }
 0x16d   : > { %1635 = vpush %v415_v26  ;;  %v519_v33 = vadd.f32 %v518_v24, %v517_v12 }
 0x16e   : > { %1637 = vpush %v451_v28  ;;  %v554_v28 = vrot.slane %v553_v20, 1  ;;  %v571_v34 = vadd.f32 %v570_v25, %v569_v16 }
 0x16f   : > { %1639 = vpush %v467_v27 }
 0x170   : > { %v555_v35 = vadd.f32 %v554_v28, %v553_v20 }
 0x19c   : > { %s1632_s26 = spop %1631 }
 0x19d   : > { %s369_s27 = smul.f32 %s1632_s26, %s365_s28  ;;  %s1634_s7 = spop %1633 }
 0x19e   : > { %s391_s8 = smul.f32 0.00390625, %s1634_s7  ;;  %s1636_s11 = spop %1635 }
 0x19f   : > { %v370_v37 = vstv %s369_s27  ;;  %s417_s16 = smul.f32 0.00390625, %s1636_s11  ;;  %s1638_s29 = spop %1637 }
 0x1a0   : > { %s395_s9 = smul.f32 %s1632_s26, %s391_s8  ;;  %v371_v40 = vsub.f32 %v2271_v7, %v370_v37  ;;  %v372_v43 = vsub.f32 %v2273_v8, %v370_v37  ;;  %s1640_s13 = spop %1639 }
 0x1a1   : > { %s421_s12 = smul.f32 %s1632_s26, %s417_s16 }
 0x1a2   : > { %v396_v45 = vstv %s395_s9  ;;  %s453_s6 = smul.f32 0.00390625, %s1638_s29  ;;  %v373_v54 = vmul.f32 %v371_v40, %v371_v40  ;;  %v374_v57 = vmul.f32 %v372_v43, %v372_v43  ;;  %v591_v40 = vpop.xlane.xlu0 %590  ;;  %v617_v43 = vpop.xlane.xlu1 %616 }
 0x1a3   : > { %v397_v47 = vsub.f32 %v2261_v2, %v396_v45  ;;  %v398_v48 = vsub.f32 %v2267_v5, %v396_v45  ;;  %v422_v49 = vstv %s421_s12  ;;  %s469_s14 = smul.f32 0.00390625, %s1640_s13  ;;  %v592_v46 = vrot.slane %v591_v40, 4 }
 0x1a4   : > { %v423_v52 = vsub.f32 %v2281_v13, %v422_v49  ;;  %v424_v53 = vsub.f32 %v2283_v14, %v422_v49  ;;  %s454_s30 = sadd.f32 1e-05, %s453_s6 }
 0x1a5   : > { %v399_v58 = vmul.f32 %v397_v47, %v397_v47  ;;  %v400_v59 = vmul.f32 %v398_v48, %v398_v48  ;;  %v618_v47 = vrot.slane %v617_v43, 4  ;;  %v593_v49 = vadd.f32 %v592_v46, %v591_v40 }
 0x1a6   : > { %v425_v61 = vmul.f32 %v423_v52, %v423_v52  ;;  %v470_v62 = vstv %s454_s30  ;;  %v426_v6 = vmul.f32 %v424_v53, %v424_v53  ;;  %v653_v44 = vpop.xlane.xlu0 %652  ;;  %v669_v45 = vpop.xlane.xlu1 %668 }
 0x1a7   : > { %v401_v3 = vadd.f32 %v399_v58, %v373_v54  ;;  %v402_v4 = vadd.f32 %v400_v59, %v374_v57  ;;  %1766 = vrcp.f32 %v470_v62  ;;  %v654_v48 = vrot.slane %v653_v44, 4 }
 0x1a8   : > { %v619_v50 = vadd.f32 %v618_v47, %v617_v43 }
 0x1a9   : > { %v427_v9 = vadd.f32 %v425_v61, %v401_v3  ;;  %v428_v10 = vadd.f32 %v426_v6, %v402_v4  ;;  %v655_v53 = vadd.f32 %v654_v48, %v653_v44  ;;  %v594_v61 = vrot.slane %v593_v49, 2 }
 0x1aa   : > { %v620_v62 = vrot.slane %v619_v50, 2 }
 0x1ab   : > { %v429_v17 = vmul.f32 %v427_v9, %v427_v9  ;;  %v430_v18 = vmul.f32 %v428_v10, %v428_v10  ;;  %v656_v11 = vrot.slane %v655_v53, 2  ;;  %v595_v24 = vadd.f32 %v594_v61, %v593_v49 }
 0x1ac   : > { %v621_v25 = vadd.f32 %v620_v62, %v619_v50 }
 0x1ad   : > { %v431_v21 = vsub.f32 0.0, %v429_v17  ;;  %v432_v22 = vsub.f32 0.0, %v430_v18 }
 0x1af   : > { %v433_v26 = vmul.f32 0.01, %v431_v21  ;;  %v434_v27 = vmul.f32 0.01, %v432_v22 }
 0x1b1   : > { %v1767_v29 = vpop.eup %1766  ;;  %v435_v30 = vmul.f32 1.442695, %v433_v26  ;;  %v437_v31 = vmul.f32 1.442695, %v434_v27 }
 0x1b2   : > { %1641 = vpush %v1767_v29  ;;  %v657_v29 = vadd.f32 %v656_v11, %v655_v53 }
 0x1b3   : > { %1768 = vpow2.f32 %v435_v30  ;;  %1643 = vpush %v493_v32  ;;  %v596_v32 = vrot.slane %v595_v24, 1 }
 0x1b4   : > { %1770 = vpow2.f32 %v437_v31  ;;  %1645 = vpush %v519_v33  ;;  %v622_v33 = vrot.slane %v621_v25, 1 }
 0x1b5   : > { %1647 = vpush %v555_v35 }
 0x1b6   : > { %1649 = vpush %v571_v34  ;;  %v623_v46 = vadd.f32 %v622_v33, %v621_v25 }
 0x1bd   : > { %v2385_v36 = vpop.eup %1768 }
 0x1be   : > { %v2387_v37 = vpop.eup %1770  ;;  %v439_v38 = vmul.f32 %v2385_v36, %v2256_v0  ;;  %v670_v0 = vrot.slane %v669_v45, 4 }
 0x1bf   : > { %v440_v39 = vmul.f32 %v2387_v37, %v2259_v1 }
 0x1c0   : > { %1492 = vmatprep.mubr.msk.f32.mxu0 %vm336_vm0, %v439_v38  ;;  %v671_v57 = vadd.f32 %v670_v0, %v669_v45  ;;  %v597_v45 = vadd.f32 %v596_v32, %v595_v24 }
 0x1c1   : > { %1493 = vmatmul.mubr.msk.f32.vlgmr.msra.gmra.mrb[0].mxu0 %vm336_vm0, %v440_v39  ;;  %v658_v39 = vrot.slane %v657_v29, 1 }
 0x1c2   : > { %v672_v17 = vrot.slane %v671_v57, 2 }
 0x1c3   : > { %v659_v48 = vadd.f32 %v658_v39, %v657_v29 }
 0x1c4   : > { %v673_v26 = vadd.f32 %v672_v17, %v671_v57 }
 0x1c6   : > { %v674_v34 = vrot.slane %v673_v26, 1 }
 0x1c8   : > { %v675_v47 = vadd.f32 %v674_v34, %v673_v26 }
 0x1e3   : > { %s1642_s23 = spop %1641 }
 0x1e4   : > { %s473_s24 = smul.f32 %s1642_s23, %s469_s14  ;;  %s1644_s17 = spop %1643 }
 0x1e5   : > { %s495_s18 = smul.f32 0.00390625, %s1644_s17  ;;  %s1646_s28 = spop %1645 }
 0x1e6   : > { %v474_v1 = vstv %s473_s24  ;;  %s521_s26 = smul.f32 0.00390625, %s1646_s28  ;;  %s1648_s27 = spop %1647 }
 0x1e7   : > { %s499_s7 = smul.f32 %s1642_s23, %s495_s18  ;;  %v475_v51 = vsub.f32 %v2271_v7, %v474_v1  ;;  %v476_v52 = vsub.f32 %v2273_v8, %v474_v1  ;;  %s1650_s29 = spop %1649 }
 0x1e8   : > { %s525_s8 = smul.f32 %s1642_s23, %s521_s26 }
 0x1e9   : > { %v500_v54 = vstv %s499_s7  ;;  %s557_s11 = smul.f32 0.00390625, %s1648_s27  ;;  %v477_v4 = vmul.f32 %v475_v51, %v475_v51  ;;  %v478_v6 = vmul.f32 %v476_v52, %v476_v52  ;;  %v695_v51 = vpop.xlane.xlu0 %694  ;;  %v721_v52 = vpop.xlane.xlu1 %720 }
 0x1ea   : > { %v501_v58 = vsub.f32 %v2261_v2, %v500_v54  ;;  %v502_v59 = vsub.f32 %v2267_v5, %v500_v54  ;;  %v526_v60 = vstv %s525_s8  ;;  %s573_s9 = smul.f32 0.00390625, %s1650_s29  ;;  %v696_v53 = vrot.slane %v695_v51, 4 }
 0x1eb   : > { %v527_v63 = vsub.f32 %v2281_v13, %v526_v60  ;;  %v528_v3 = vsub.f32 %v2283_v14, %v526_v60  ;;  %s558_s16 = sadd.f32 1e-05, %s557_s11  ;;  %v722_v54 = vrot.slane %v721_v52, 4 }
 0x1ec   : > { %v503_v9 = vmul.f32 %v501_v58, %v501_v58  ;;  %v504_v10 = vmul.f32 %v502_v59, %v502_v59 }
 0x1ed   : > { %v529_v12 = vmul.f32 %v527_v63, %v527_v63  ;;  %v574_v16 = vstv %s558_s16  ;;  %v530_v21 = vmul.f32 %v528_v3, %v528_v3  ;;  %v723_v59 = vadd.f32 %v722_v54, %v721_v52 }
 0x1ee   : > { %v505_v18 = vadd.f32 %v503_v9, %v477_v4  ;;  %v506_v20 = vadd.f32 %v504_v10, %v478_v6  ;;  %1772 = vrcp.f32 %v574_v16 }
 0x1ef   : > { %v724_v16 = vrot.slane %v723_v59, 2 }
 0x1f0   : > { %v531_v22 = vadd.f32 %v529_v12, %v505_v18  ;;  %v532_v23 = vadd.f32 %v530_v21, %v506_v20 }
 0x1f1   : > { %v725_v26 = vadd.f32 %v724_v16, %v723_v59 }
 0x1f2   : > { %v533_v27 = vmul.f32 %v531_v22, %v531_v22  ;;  %v534_v28 = vmul.f32 %v532_v23, %v532_v23 }
 0x1f3   : > { %v726_v32 = vrot.slane %v725_v26, 1 }
 0x1f4   : > { %v535_v30 = vsub.f32 0.0, %v533_v27  ;;  %v536_v31 = vsub.f32 0.0, %v534_v28 }
 0x1f6   : > { %v537_v35 = vmul.f32 0.01, %v535_v30  ;;  %v538_v38 = vmul.f32 0.01, %v536_v31 }
 0x1f8   : > { %v1773_v40 = vpop.eup %1772  ;;  %v539_v43 = vmul.f32 1.442695, %v537_v35  ;;  %v541_v44 = vmul.f32 1.442695, %v538_v38 }
 0x1f9   : > { %1651 = vpush %v1773_v40 }
 0x1fa   : > { %1774 = vpow2.f32 %v539_v43  ;;  %1653 = vpush %v597_v45  ;;  %v727_v43 = vadd.f32 %v726_v32, %v725_v26 }
 0x1fb   : > { %1776 = vpow2.f32 %v541_v44  ;;  %1655 = vpush %v623_v46 }
 0x1fc   : > { %1657 = vpush %v659_v48 }
 0x1fd   : > { %1659 = vpush %v675_v47 }
 0x204   : > { %v2401_v0 = vpop.eup %1774 }
 0x205   : > { %v2403_v1 = vpop.eup %1776  ;;  %v543_v49 = vmul.f32 %v2401_v0, %v2286_v15  ;;  %v697_v15 = vadd.f32 %v696_v53, %v695_v51 }
 0x206   : > { %v544_v50 = vmul.f32 %v2403_v1, %v2294_v19 }
 0x207   : > { %1495 = vmatprep.mubr.msk.f32.mxu0 %vm336_vm0, %v543_v49  ;;  %v698_v3 = vrot.slane %v697_v15, 2 }
 0x208   : > { %1496 = vmatmul.mubr.msk.f32.gmra.mrb[2].mxu0 %vm336_vm0, %v544_v50 }
 0x209   : > { %v699_v25 = vadd.f32 %v698_v3, %v697_v15 }
 0x20b   : > { %v700_v31 = vrot.slane %v699_v25, 1 }
 0x20d   : > { %v701_v40 = vadd.f32 %v700_v31, %v699_v25 }
 0x22a   : > { %s1652_s12 = spop %1651 }
 0x22b   : > { %s577_s6 = smul.f32 %s1652_s12, %s573_s9  ;;  %s1654_s30 = spop %1653 }
 0x22c   : > { %s599_s13 = smul.f32 0.00390625, %s1654_s30  ;;  %s1656_s14 = spop %1655 }
 0x22d   : > { %v578_v57 = vstv %s577_s6  ;;  %s625_s23 = smul.f32 0.00390625, %s1656_s14  ;;  %s1658_s24 = spop %1657 }
 0x22e   : > { %s603_s17 = smul.f32 %s1652_s12, %s599_s13  ;;  %v579_v19 = vsub.f32 %v2271_v7, %v578_v57  ;;  %v580_v58 = vsub.f32 %v2273_v8, %v578_v57  ;;  %s1660_s27 = spop %1659 }
 0x22f   : > { %s629_s18 = smul.f32 %s1652_s12, %s625_s23  ;;  %s1142_s13 = sand.u32 127, %s2053_s22 }
 0x230   : > { %v604_v60 = vstv %s603_s17  ;;  %s661_s28 = smul.f32 0.00390625, %s1658_s24  ;;  %v581_v9 = vmul.f32 %v579_v19, %v579_v19  ;;  %v582_v10 = vmul.f32 %v580_v58, %v580_v58  ;;  %s1434_s24 = scalar_lea.smem [#allocation10], %s1994_s21 }
 0x231   : > { %v605_v61 = vsub.f32 %v2261_v2, %v604_v60  ;;  %v606_v62 = vsub.f32 %v2267_v5, %v604_v60  ;;  %v630_v63 = vstv %s629_s18  ;;  %s677_s7 = smul.f32 0.00390625, %s1660_s27  ;;  %s1435_s17 = scalar_lea.smem %s1434_s24, 4294967295 [#allocation10] }
 0x232   : > { %v631_v4 = vsub.f32 %v2281_v13, %v630_v63  ;;  %v632_v6 = vsub.f32 %v2283_v14, %v630_v63  ;;  %s662_s26 = sadd.f32 1e-05, %s661_s28  ;;  %s1436_s28 = scalar_lea.smem [#allocation11], %s1994_s21 }
 0x233   : > { %v607_v11 = vmul.f32 %v605_v61, %v605_v61  ;;  %v608_v12 = vmul.f32 %v606_v62, %v606_v62 }
 0x234   : > { %v633_v17 = vmul.f32 %v631_v4, %v631_v4  ;;  %v678_v18 = vstv %s662_s26  ;;  %v634_v22 = vmul.f32 %v632_v6, %v632_v6  ;;  %s1437_s26 = scalar_lea.smem %s1436_s28, 4294967295 [#allocation11] }
 0x235   : > { %v609_v20 = vadd.f32 %v607_v11, %v581_v9  ;;  %v610_v21 = vadd.f32 %v608_v12, %v582_v10  ;;  %1778 = vrcp.f32 %v678_v18 }
 0x237   : > { %v635_v23 = vadd.f32 %v633_v17, %v609_v20  ;;  %v636_v24 = vadd.f32 %v634_v22, %v610_v21 }
 0x239   : > { %v637_v27 = vmul.f32 %v635_v23, %v635_v23  ;;  %v638_v28 = vmul.f32 %v636_v24, %v636_v24 }
 0x23b   : > { %v639_v29 = vsub.f32 0.0, %v637_v27  ;;  %v640_v30 = vsub.f32 0.0, %v638_v28 }
 0x23d   : > { %v641_v33 = vmul.f32 0.01, %v639_v29  ;;  %v642_v34 = vmul.f32 0.01, %v640_v30 }
 0x23f   : > { %v1779_v35 = vpop.eup %1778  ;;  %v643_v38 = vmul.f32 1.442695, %v641_v33  ;;  %v645_v39 = vmul.f32 1.442695, %v642_v34 }
 0x240   : > { %1661 = vpush %v1779_v35 }
 0x241   : > { %1780 = vpow2.f32 %v643_v38  ;;  %1663 = vpush %v701_v40 }
 0x242   : > { %1782 = vpow2.f32 %v645_v39  ;;  %1665 = vpush %v727_v43  ;;  %v300_v43 = vld [vmem:[#allocation7 + $0x8] sm:$0xff] }
 0x24b   : > { %v1781_v44 = vpop.eup %1780 }
 0x24c   : > { %v1783_v45 = vpop.eup %1782  ;;  %v647_v46 = vmul.f32 %v1781_v44, %v2322_v41 }
 0x24d   : > { %v648_v47 = vmul.f32 %v1783_v45, %v2325_v42 }
 0x24e   : > { %1498 = vmatprep.mubr.msk.f32.mxu0 %vm336_vm0, %v647_v46  ;;  %v307_v46 = vld [vmem:[#allocation7 + $0x40] sm:$0xff] }
 0x24f   : > { %1499 = vmatmul.mubr.msk.f32.gmra.mrb[4].mxu0 %vm336_vm0, %v648_v47  ;;  %v302_v47 = vld [vmem:[#allocation7 + $0x18] sm:$0xff] }
 0x271   : > { %s1662_s8 = spop %1661 }
 0x272   : > { %s681_s11 = smul.f32 %s1662_s8, %s677_s7  ;;  %s1664_s16 = spop %1663 }
 0x273   : > { %s703_s29 = smul.f32 0.00390625, %s1664_s16  ;;  %s1666_s9 = spop %1665 }
 0x274   : > { %v682_v48 = vstv %s681_s11  ;;  %s729_s12 = smul.f32 0.00390625, %s1666_s9 }
 0x275   : > { %s707_s6 = smul.f32 %s1662_s8, %s703_s29  ;;  %v683_v49 = vsub.f32 %v2271_v7, %v682_v48  ;;  %v684_v41 = vsub.f32 %v2273_v8, %v682_v48  ;;  %v308_v48 = vld [vmem:[#allocation7 + $0x48] sm:$0xff] }
 0x276   : > { %s733_s30 = smul.f32 %s1662_s8, %s729_s12 }
 0x277   : > { %v708_v42 = vstv %s707_s6  ;;  %v685_v57 = vmul.f32 %v683_v49, %v683_v49  ;;  %v686_v15 = vmul.f32 %v684_v41, %v684_v41  ;;  %v303_v49 = vld [vmem:[#allocation7 + $0x20] sm:$0xff]  ;;  %v309_v41 = vld [vmem:[#allocation7 + $0x50] sm:$0xff] }
 0x278   : > { %v709_v50 = vsub.f32 %v2261_v2, %v708_v42  ;;  %v710_v51 = vsub.f32 %v2267_v5, %v708_v42  ;;  %v734_v52 = vstv %s733_s30  ;;  %v304_v42 = vld [vmem:[#allocation7 + $0x28] sm:$0xff] }
 0x279   : > { %v735_v53 = vsub.f32 %v2281_v13, %v734_v52  ;;  %v736_v54 = vsub.f32 %v2283_v14, %v734_v52  ;;  %v312_v52 = vld [vmem:[#allocation7 + $0x68] sm:$0xff] }
 0x27a   : > { %v711_v19 = vmul.f32 %v709_v50, %v709_v50  ;;  %v712_v58 = vmul.f32 %v710_v51, %v710_v51  ;;  %v310_v50 = vld [vmem:[#allocation7 + $0x58] sm:$0xff]  ;;  %v311_v51 = vld [vmem:[#allocation7 + $0x60] sm:$0xff] }
 0x27b   : > { %v737_v7 = vmul.f32 %v735_v53, %v735_v53  ;;  %v738_v61 = vmul.f32 %v736_v54, %v736_v54  ;;  %v313_v53 = vld [vmem:[#allocation7 + $0x70] sm:$0xff]  ;;  %v314_v54 = vld [vmem:[#allocation7 + $0x78] sm:$0xff] }
 0x27c   : > { %v713_v59 = vadd.f32 %v711_v19, %v685_v57  ;;  %v714_v60 = vadd.f32 %v712_v58, %v686_v15  ;;  %v1788_v19 = vld [vmem:[%s2236_s25 + $0x8] sm:$0xff] }
 0x27e   : > { %v739_v8 = vadd.f32 %v737_v7, %v713_v59  ;;  %v740_v62 = vadd.f32 %v738_v61, %v714_v60  ;;  %v1789_v61 = vld [vmem:[%s2236_s25] sm:$0xff] }
 0x280   : > { %v741_v63 = vmul.f32 %v739_v8, %v739_v8  ;;  %v742_v3 = vmul.f32 %v740_v62, %v740_v62 }
 0x282   : > { %v743_v2 = vsub.f32 0.0, %v741_v63  ;;  %v744_v4 = vsub.f32 0.0, %v742_v3 }
 0x284   : > { %v745_v5 = vmul.f32 0.01, %v743_v2  ;;  %v746_v6 = vmul.f32 0.01, %v744_v4 }
 0x286   : > { %v747_v9 = vmul.f32 1.442695, %v745_v5  ;;  %v749_v13 = vmul.f32 1.442695, %v746_v6 }
 0x288   : > { %1784 = vpow2.f32 %v747_v9  ;;  %v1790_v9 = vld [vmem:[%s2236_s25 + $0x18] sm:$0xff] }
 0x289   : > { %1786 = vpow2.f32 %v749_v13 }
 0x292   : > { %v1785_v14 = vpop.eup %1784 }
 0x293   : > { %v1787_v10 = vpop.eup %1786  ;;  %v751_v11 = vmul.f32 %v1785_v14, %v2342_v55 }
 0x294   : > { %v752_v12 = vmul.f32 %v1787_v10, %v2345_v56  ;;  %v1494_v16 = vpop.f32.mrb[0].mxu0 }
 0x295   : > { %1501 = vmatprep.mubr.msk.f32.mxu0 %vm336_vm0, %v751_v11  ;;  %v867_v17 = vpop.f32.mrb[1].mxu0 }
 0x296   : > { %1502 = vmatmul.mubr.msk.f32.gmra.mrb[6].mxu0 %vm336_vm0, %v752_v12  ;;  %v1576_v18 = vpack.c.bf16 %v1494_v16, %v867_v17  ;;  %v1791_v16 = vld [vmem:[%s2236_s25 + $0x10] sm:$0xff] }
 0x297   : > { %1504 = vmatprep.mubr.msk.f32.mxu0 %vm336_vm0, %v2385_v36 }
 0x298   : > { %1577 = vmatprep.subr.bf16.mxu0 %v1576_v18  ;;  %1608 = vmatprep.subr.bf16.mxu1 %v1576_v18 }
 0x299   : > { %1579 = vmatpush3.bf16.msra.mxu0 %v1576_v18  ;;  %1616 = vmatpush3.bf16.msra.mxu1 %v1576_v18 }
 0x29a   : > { %1505 = vmatmul.mubr.msk.f32.gmra.mrb[8].mxu0 %vm336_vm0, %v2387_v37  ;;  %v299_v37 = vld [vmem:[#allocation7] sm:$0xff] }
 0x29b   : > { %1507 = vmatprep.mubr.msk.f32.mxu0 %vm336_vm0, %v2401_v0  ;;  %v305_v0 = vld [vmem:[#allocation7 + $0x30] sm:$0xff] }
 0x29c   : > { %1557 = vmatprep.mubr.f32.mxu1 %v305_v0 }
 0x29e   : > { %1508 = vmatmul.mubr.msk.f32.gmra.mrb[10].mxu0 %vm336_vm0, %v2403_v1 }
 0x29f   : > { %1510 = vmatprep.mubr.msk.f32.mxu0 %vm336_vm0, %v1781_v44  ;;  %v306_v44 = vld [vmem:[#allocation7 + $0x38] sm:$0xff] }
 0x2a2   : > { %1511 = vmatmul.mubr.msk.f32.gmra.mrb[12].mxu0 %vm336_vm0, %v1783_v45  ;;  %v301_v45 = vld [vmem:[#allocation7 + $0x10] sm:$0xff] }
 0x2a3   : > { %1513 = vmatprep.mubr.msk.f32.mxu0 %vm336_vm0, %v1785_v14 }
 0x2a6   : > { %1514 = vmatmul.mubr.msk.f32.gmra.mrb[14].mxu0 %vm336_vm0, %v1787_v10 }
 0x2a7   : > { %1548 = vmatprep.mubr.f32.mxu0 %v299_v37 }
 0x2db   : > { %v1497_v36 = vpop.f32.mrb[2].mxu0 }
 0x2dc   : > { %v877_v20 = vpop.f32.mrb[3].mxu0 }
 0x2dd   : > { %v1580_v21 = vpack.c.bf16 %v1497_v36, %v877_v20 }
 0x2df   : > { %1581 = vmatprep.subr.bf16.mxu0 %v1580_v21  ;;  %1609 = vmatprep.subr.bf16.mxu1 %v1580_v21 }
 0x2e0   : > { %1583 = vmatpush3.bf16.msra.mxu0 %v1580_v21  ;;  %1617 = vmatpush3.bf16.msra.mxu1 %v1580_v21 }
 0x322   : > { %v1500_v1 = vpop.f32.mrb[4].mxu0 }
 0x323   : > { %v887_v22 = vpop.f32.mrb[5].mxu0 }
 0x324   : > { %v1584_v23 = vpack.c.bf16 %v1500_v1, %v887_v22  ;;  %v1792_v1 = vld [vmem:[%s2236_s25 + $0x28] sm:$0xff] }
 0x326   : > { %1585 = vmatprep.subr.bf16.mxu0 %v1584_v23  ;;  %1610 = vmatprep.subr.bf16.mxu1 %v1584_v23 }
 0x327   : > { %1587 = vmatpush3.bf16.msra.mxu0 %v1584_v23  ;;  %1618 = vmatpush3.bf16.msra.mxu1 %v1584_v23 }
 0x369   : > { %v1503_v24 = vpop.f32.mrb[6].mxu0 }
 0x36a   : > { %v897_v25 = vpop.f32.mrb[7].mxu0 }
 0x36b   : > { %v1588_v26 = vpack.c.bf16 %v1503_v24, %v897_v25 }
 0x36d   : > { %v1506_v27 = vpop.f32.mrb[8].mxu0  ;;  %1589 = vmatprep.subr.bf16.mxu0 %v1588_v26  ;;  %1611 = vmatprep.subr.bf16.mxu1 %v1588_v26 }
 0x36e   : > { %v907_v28 = vpop.f32.mrb[9].mxu0  ;;  %1591 = vmatpush3.bf16.msra.mxu0 %v1588_v26  ;;  %1619 = vmatpush3.bf16.msra.mxu1 %v1588_v26 }
 0x36f   : > { %v1592_v29 = vpack.c.bf16 %v1506_v27, %v907_v28  ;;  %v1793_v28 = vld [vmem:[%s2236_s25 + $0x20] sm:$0xff] }
 0x371   : > { %v1509_v30 = vpop.f32.mrb[10].mxu0  ;;  %1593 = vmatprep.subr.bf16.mxu0 %v1592_v29  ;;  %1612 = vmatprep.subr.bf16.mxu1 %v1592_v29 }
 0x372   : > { %v917_v31 = vpop.f32.mrb[11].mxu0  ;;  %1595 = vmatpush3.bf16.msra.mxu0 %v1592_v29  ;;  %1620 = vmatpush3.bf16.msra.mxu1 %v1592_v29 }
 0x373   : > { %v1596_v32 = vpack.c.bf16 %v1509_v30, %v917_v31 }
 0x375   : > { %v1512_v33 = vpop.f32.mrb[12].mxu0  ;;  %1597 = vmatprep.subr.bf16.mxu0 %v1596_v32  ;;  %1613 = vmatprep.subr.bf16.mxu1 %v1596_v32 }
 0x376   : > { %v927_v34 = vpop.f32.mrb[13].mxu0  ;;  %1599 = vmatpush3.bf16.msra.mxu0 %v1596_v32  ;;  %1621 = vmatpush3.bf16.msra.mxu1 %v1596_v32 }
 0x377   : > { %v1600_v35 = vpack.c.bf16 %v1512_v33, %v927_v34 }
 0x379   : > { %v1515_v38 = vpop.f32.mrb[14].mxu0  ;;  %1601 = vmatprep.subr.bf16.mxu0 %v1600_v35  ;;  %1614 = vmatprep.subr.bf16.mxu1 %v1600_v35 }
 0x37a   : > { %v937_v39 = vpop.f32.mrb[15].mxu0  ;;  %1603 = vmatpush3.bf16.msra.mxu0 %v1600_v35  ;;  %1622 = vmatpush3.bf16.msra.mxu1 %v1600_v35 }
 0x37b   : > { %v1604_v40 = vpack.c.bf16 %v1515_v38, %v937_v39 }
 0x37d   : > { %1605 = vmatprep.subr.bf16.mxu0 %v1604_v40  ;;  %1615 = vmatprep.subr.bf16.mxu1 %v1604_v40 }
 0x37e   : > { %1607 = vmatpush3.bf16.msra.mxu0 %v1604_v40  ;;  %1623 = vmatpush3.bf16.msra.mxu1 %v1604_v40 }
 0x381   : > { %1549 = vmatmul.mubr.f32.vlgmr.msra.gmra.mrb[16].mxu0 %v300_v43  ;;  %1558 = vmatmul.mubr.f32.vlgmr.msra.gmra.mrb[0].mxu1 %v306_v44 }
 0x382   : > { %1551 = vmatprep.mubr.f32.mxu0 %v301_v45  ;;  %1560 = vmatprep.mubr.f32.mxu1 %v307_v46 }
 0x385   : > { %1552 = vmatmul.mubr.f32.gmra.mrb[18].mxu0 %v302_v47  ;;  %1561 = vmatmul.mubr.f32.gmra.mrb[2].mxu1 %v308_v48  ;;  %v1794_v48 = vld [vmem:[%s2236_s25 + $0x38] sm:$0xff] }
 0x386   : > { %1554 = vmatprep.mubr.f32.mxu0 %v303_v49  ;;  %1563 = vmatprep.mubr.f32.mxu1 %v309_v41 }
 0x389   : > { %1555 = vmatmul.mubr.f32.gmra.mrb[20].mxu0 %v304_v42  ;;  %1564 = vmatmul.mubr.f32.gmra.mrb[4].mxu1 %v310_v50  ;;  %v1795_v50 = vld [vmem:[%s2236_s25 + $0x30] sm:$0xff]  ;;  %s1137_s25 = sshra.s32 %s2053_s22, 7 }
 0x38a   : > { %1566 = vmatprep.mubr.f32.mxu1 %v311_v51  ;;  %s1421_s14 = sshll.u32 %s1137_s25, 7 }
 0x38b   : > { %s1304_s23 = sadd.s32 %s1421_s14, %s1142_s13  ;;  %s1239_s13 = sshll.u32 %s2520_s4, 4  ;;  %s1240_s13 = int_to_ptr.vmem [resolvable:$true] %s1239_s13 }
 0x38c   : > { %s1305_s27 = scalar_lea.smem [#allocation10], %s1304_s23  ;;  %s2473_s8 = scalar_lea.smem [#allocation11], %s1304_s23 }
 0x38d   : > { %1567 = vmatmul.mubr.f32.gmra.mrb[6].mxu1 %v312_v52  ;;  %s1306_s7 = scalar_lea.smem %s1305_s27, 128 [#allocation10]  ;;  %s1310_s11 = scalar_lea.smem %s2473_s8, 128 [#allocation11] }
 0x38e   : > { %1569 = vmatprep.mubr.f32.mxu1 %v313_v53  ;;  %s1314_s16 = scalar_lea.smem %s1305_s27, 256 [#allocation10]  ;;  %s1318_s29 = scalar_lea.smem %s2473_s8, 256 [#allocation11] }
 0x38f   : > { %s1322_s9 = scalar_lea.smem %s1305_s27, 384 [#allocation10]  ;;  %s1326_s6 = scalar_lea.smem %s2473_s8, 384 [#allocation11] }
 0x390   : > { %s1912_s27 = scalar_lea.vmem %s1240_s13, 64  ;;  %p1919_p13 = scmp.lt.s32.totalorder %s1240_s13, %s1240_s13 }
 0x391   : > { %1570 = vmatmul.mubr.f32.gmra.mrb[8].mxu1 %v314_v54  ;;  %p1913_p12 = scmp.ne.s32.totalorder %s1240_s13, %s1912_s27  ;;  %p1920_p3 = scmp.lt.s32.totalorder %s1912_s27, %s1912_s27 }
 0x393   : > { %p1914_p0 = pnand %p1913_p12, %p1722_p10  ;;  %p1921_p9 = por %p1920_p3, %p1919_p13 }
 0x395   : > { %p1915_p2 = pneg %p1914_p0 }
 0x397   : > { %p1922_p1 = pnand %p1921_p9, %p1915_p2 }
 0x454   : > { %v1550_v57 = vpop.f32.mrb[16].mxu0  ;;  %v1559_v15 = vpop.f32.mrb[0].mxu1 }
 0x455   : > { %v1092_v58 = vmul.f32 %v1788_v19, %v1550_v57  ;;  %v1198_v59 = vmul.f32 %v1559_v15, %v2345_v56  ;;  %v1012_v60 = vpop.f32.mrb[17].mxu0  ;;  %v1042_v7 = vpop.f32.mrb[1].mxu1 }
 0x456   : > { %v1091_v8 = vmul.f32 %v1789_v61, %v1012_v60  ;;  %v1197_v62 = vmul.f32 %v2342_v55, %v1042_v7 }
 0x457   : > { %v1094_v63 = vsel %vm336_vm0, %v1092_v58, 0.0  ;;  %v1200_v3 = vsel %vm336_vm0, %v1198_v59, 0.0 }
 0x458   : > { %v1553_v2 = vpop.f32.mrb[18].mxu0  ;;  %v1562_v4 = vpop.f32.mrb[2].mxu1  ;;  %v1093_v5 = vsel %vm336_vm0, %v1091_v8, 0.0  ;;  %v1199_v6 = vsel %vm336_vm0, %v1197_v62, 0.0 }
 0x459   : > { %v1124_v13 = vmul.f32 %v1790_v9, %v1553_v2  ;;  %v1108_v56 = vmul.f32 %v1788_v19, %v1562_v4  ;;  %v1022_v14 = vpop.f32.mrb[19].mxu0  ;;  %v1052_v10 = vpop.f32.mrb[3].mxu1  ;;  %v1095_v11 = vadd.f32 %v1094_v63, %v1093_v5  ;;  %v1201_v12 = vadd.f32 %v1200_v3, %v1199_v6 }
 0x45a   : > { %v1123_v55 = vmul.f32 %v1791_v16, %v1022_v14  ;;  %v1107_v17 = vmul.f32 %v1789_v61, %v1052_v10 }
 0x45b   : > { %1096 = vadd.xlane.f32.xlu0 %v1095_v11  ;;  %v1110_v18 = vsel %vm336_vm0, %v1108_v56, 0.0  ;;  %v1126_v36 = vsel %vm336_vm0, %v1124_v13, 0.0 }
 0x45c   : > { %v1556_v20 = vpop.f32.mrb[20].mxu0  ;;  %v1565_v21 = vpop.f32.mrb[4].mxu1  ;;  %v1109_v37 = vsel %vm336_vm0, %v1107_v17, 0.0  ;;  %v1125_v0 = vsel %vm336_vm0, %v1123_v55, 0.0 }
 0x45d   : > { %v1163_v22 = vmul.f32 %v1792_v1, %v1556_v20  ;;  %v1147_v23 = vmul.f32 %v1790_v9, %v1565_v21  ;;  %v1032_v24 = vpop.f32.mrb[21].mxu0  ;;  %v1062_v25 = vpop.f32.mrb[5].mxu1  ;;  %v1111_v26 = vadd.f32 %v1110_v18, %v1109_v37  ;;  %v1127_v27 = vadd.f32 %v1126_v36, %v1125_v0 }
 0x45e   : > { %v1162_v29 = vmul.f32 %v1793_v28, %v1032_v24  ;;  %v1146_v30 = vmul.f32 %v1791_v16, %v1062_v25 }
 0x45f   : > { %1112 = vadd.xlane.f32.xlu1 %v1111_v26  ;;  %1128 = vadd.xlane.f32.xlu0 %v1127_v27  ;;  %v1149_v31 = vsel %vm336_vm0, %v1147_v23, 0.0  ;;  %v1165_v32 = vsel %vm336_vm0, %v1163_v22, 0.0 }
 0x460   : > { %v1568_v33 = vpop.f32.mrb[6].mxu1  ;;  %v1148_v34 = vsel %vm336_vm0, %v1146_v30, 0.0  ;;  %v1164_v35 = vsel %vm336_vm0, %v1162_v29, 0.0 }
 0x461   : > { %v1182_v38 = vmul.f32 %v1792_v1, %v1568_v33  ;;  %v1072_v39 = vpop.f32.mrb[7].mxu1  ;;  %v1150_v40 = vadd.f32 %v1149_v31, %v1148_v34  ;;  %v1166_v43 = vadd.f32 %v1165_v32, %v1164_v35 }
 0x462   : > { %v1181_v44 = vmul.f32 %v1793_v28, %v1072_v39 }
 0x463   : > { %1151 = vadd.xlane.f32.xlu1 %v1150_v40  ;;  %1167 = vadd.xlane.f32.xlu0 %v1166_v43  ;;  %v1184_v45 = vsel %vm336_vm0, %v1182_v38, 0.0 }
 0x464   : > { %v1571_v46 = vpop.f32.mrb[8].mxu1  ;;  %v1183_v47 = vsel %vm336_vm0, %v1181_v44, 0.0 }
 0x465   : > { %v1217_v49 = vmul.f32 %v1794_v48, %v1571_v46  ;;  %v1082_v41 = vpop.f32.mrb[9].mxu1  ;;  %v1185_v42 = vadd.f32 %v1184_v45, %v1183_v47 }
 0x466   : > { %v1216_v51 = vmul.f32 %v1795_v50, %v1082_v41 }
 0x467   : > { %1186 = vadd.xlane.f32.xlu1 %v1185_v42  ;;  %1202 = vadd.xlane.f32.xlu0 %v1201_v12  ;;  %v1219_v52 = vsel %vm336_vm0, %v1217_v49, 0.0 }
 0x468   : > { %v1218_v53 = vsel %vm336_vm0, %v1216_v51, 0.0 }
 0x469   : > { %v1220_v54 = vadd.f32 %v1219_v52, %v1218_v53 }
 0x46b   : > { %1221 = vadd.xlane.f32.xlu1 %v1220_v54 }
 0x4e8   : > { %v1097_v57 = vpop.xlane.xlu0 %1096 }
 0x4e9   : > { %v1098_v15 = vrot.slane %v1097_v57, 4 }
 0x4eb   : > { %v1099_v19 = vadd.f32 %v1098_v15, %v1097_v57 }
 0x4ec   : > { %v1113_v58 = vpop.xlane.xlu1 %1112  ;;  %v1129_v59 = vpop.xlane.xlu0 %1128 }
 0x4ed   : > { %v1100_v60 = vrot.slane %v1099_v19, 2  ;;  %v1114_v7 = vrot.slane %v1113_v58, 4  ;;  %v1130_v61 = vrot.slane %v1129_v59, 4 }
 0x4ef   : > { %v1115_v8 = vadd.f32 %v1114_v7, %v1113_v58  ;;  %v1131_v62 = vadd.f32 %v1130_v61, %v1129_v59  ;;  %v1101_v63 = vadd.f32 %v1100_v60, %v1099_v19 }
 0x4f0   : > { %v1152_v3 = vpop.xlane.xlu1 %1151  ;;  %v1168_v2 = vpop.xlane.xlu0 %1167 }
 0x4f1   : > { %v1116_v4 = vrot.slane %v1115_v8, 2  ;;  %v1132_v5 = vrot.slane %v1131_v62, 2  ;;  %v1153_v6 = vrot.slane %v1152_v3, 4  ;;  %v1169_v9 = vrot.slane %v1168_v2, 4 }
 0x4f2   : > { %v1102_v13 = vrot.slane %v1101_v63, 1 }
 0x4f3   : > { %v1154_v56 = vadd.f32 %v1153_v6, %v1152_v3  ;;  %v1170_v14 = vadd.f32 %v1169_v9, %v1168_v2  ;;  %v1117_v10 = vadd.f32 %v1116_v4, %v1115_v8  ;;  %v1133_v11 = vadd.f32 %v1132_v5, %v1131_v62 }
 0x4f4   : > { %v1187_v12 = vpop.xlane.xlu1 %1186  ;;  %v1203_v16 = vpop.xlane.xlu0 %1202  ;;  %v1103_v55 = vadd.f32 %v1102_v13, %v1101_v63 }
 0x4f5   : > { %v1155_v17 = vrot.slane %v1154_v56, 2  ;;  %v1171_v18 = vrot.slane %v1170_v14, 2  ;;  %v1188_v36 = vrot.slane %v1187_v12, 4  ;;  %v1204_v20 = vrot.slane %v1203_v16, 4 }
 0x4f6   : > { %1667 = vpush %v1103_v55  ;;  %v1118_v21 = vrot.slane %v1117_v10, 1  ;;  %v1134_v37 = vrot.slane %v1133_v11, 1 }
 0x4f7   : > { %v1189_v0 = vadd.f32 %v1188_v36, %v1187_v12  ;;  %v1205_v1 = vadd.f32 %v1204_v20, %v1203_v16  ;;  %v1156_v22 = vadd.f32 %v1155_v17, %v1154_v56  ;;  %v1172_v23 = vadd.f32 %v1171_v18, %v1170_v14 }
 0x4f8   : > { %v1222_v24 = vpop.xlane.xlu1 %1221  ;;  %v1119_v25 = vadd.f32 %v1118_v21, %v1117_v10  ;;  %v1135_v26 = vadd.f32 %v1134_v37, %v1133_v11 }
 0x4f9   : > { %v1190_v27 = vrot.slane %v1189_v0, 2  ;;  %v1206_v28 = vrot.slane %v1205_v1, 2  ;;  %v1223_v29 = vrot.slane %v1222_v24, 4  ;;  %v1157_v30 = vrot.slane %v1156_v22, 1 }
 0x4fa   : > { %1669 = vpush %v1119_v25  ;;  %v1173_v31 = vrot.slane %v1172_v23, 1 }
 0x4fb   : > { %v1207_v32 = vadd.f32 %v1206_v28, %v1205_v1  ;;  %v1224_v33 = vadd.f32 %v1223_v29, %v1222_v24  ;;  %1671 = vpush %v1135_v26  ;;  %v1158_v34 = vadd.f32 %v1157_v30, %v1156_v22  ;;  %v1191_v35 = vadd.f32 %v1190_v27, %v1189_v0 }
 0x4fc   : > { %v1174_v38 = vadd.f32 %v1173_v31, %v1172_v23 }
 0x4fd   : > { %v1225_v39 = vrot.slane %v1224_v33, 2  ;;  %1673 = vpush %v1158_v34  ;;  %v1192_v40 = vrot.slane %v1191_v35, 1  ;;  %v1208_v43 = vrot.slane %v1207_v32, 1 }
 0x4fe   : > { %1675 = vpush %v1174_v38 }
 0x4ff   : > { %v1226_v44 = vadd.f32 %v1225_v39, %v1224_v33  ;;  %v1193_v45 = vadd.f32 %v1192_v40, %v1191_v35  ;;  %v1209_v46 = vadd.f32 %v1208_v43, %v1207_v32 }
 0x501   : > { %1677 = vpush %v1193_v45  ;;  %v1227_v47 = vrot.slane %v1226_v44, 1 }
 0x502   : > { %1679 = vpush %v1209_v46 }
 0x503   : > { %v1228_v48 = vadd.f32 %v1227_v47, %v1226_v44 }
 0x505   : > { %1681 = vpush %v1228_v48 }
 0x527   : > { %s1668_s18 = spop %1667 }
 0x528   : > { %1106 = sst [smem:[%s1435_s17]] %s1668_s18  ;;  %s1250_s18 = sshll.u32 %s2521_s5, 4  ;;  %s1251_s18 = int_to_ptr.vmem [resolvable:$true] %s1250_s18 }
 0x52b   : > { %s1670_s12 = spop %1669 }
 0x52c   : > { %1122 = sst [smem:[%s1437_s26]] %s1670_s12  ;;  %s1672_s30 = spop %1671 }
 0x52d   : > { %1145 = sst [smem:[%s1306_s7]] %s1672_s30 }
 0x52e   : > { %s1674_s14 = spop %1673 }
 0x52f   : > { %1161 = sst [smem:[%s1310_s11]] %s1674_s14  ;;  %s1676_s23 = spop %1675 }
 0x530   : > { %1180 = sst [smem:[%s1314_s16]] %s1676_s23 }
 0x532   : > { %s1678_s28 = spop %1677 }
 0x533   : > { %1196 = sst [smem:[%s1318_s29]] %s1678_s28  ;;  %s1680_s26 = spop %1679 }
 0x534   : > { %1215 = sst [smem:[%s1322_s9]] %s1680_s26 }
 0x535   : > { %1925 = shalt.err (!%p1922_p1)
}
 0x536   : > { %s2002_s7 = smov [#allocation10]   ;;  %s1682_s11 = spop %1681 }
 0x537   : > { %1696 = dma.smem_to_vmem (%p1722_p10), %s2002_s7, 64, %s1240_s13, [#allocation4]  }
 0x538   : > { %1231 = sst [smem:[%s1326_s6]] %s1682_s11  ;;  %s1926_s16 = scalar_lea.vmem %s1251_s18, 64 }
 0x539   : > { %p1927_p11 = scmp.ne.s32.totalorder %s1251_s18, %s1926_s16  ;;  %p1933_p4 = scmp.lt.s32.totalorder %s1251_s18, %s1251_s18 }
 0x53a   : > { %p1934_p5 = scmp.lt.s32.totalorder %s1926_s16, %s1926_s16 }
 0x53b   : > { %p1928_p6 = pnand %p1927_p11, %p1722_p10 }
 0x53c   : > { %p1935_p8 = por %p1934_p5, %p1933_p4 }
 0x53d   : > { %p1929_p7 = pneg %p1928_p6 }
 0x53f   : > { %p1936_p12 = pnand %p1935_p8, %p1929_p7 }
 0x541   : > { %1939 = shalt.err (!%p1936_p12)
}
 0x542   : > { %s2003_s29 = smov [#allocation11]  }
 0x543   : > { %1698 = dma.smem_to_vmem (%p1722_p10), %s2003_s29, 64, %s1251_s18, [#allocation12]  }
 0x544   : > { %1973 = dma.done.wait (%p1722_p10), [#allocation4], 64  }
 0x545   : > { %1975 = vsyncadd (%p1722_p10), [#allocation4], 4294967232 }
 0x546   : > { %1977 = dma.done.wait (%p1722_p10), [#allocation12], 64  }
 0x547   : > { %1979 = vsyncadd (%p1722_p10), [#allocation12], 4294967232 }
 0x548   : > { %1262 = sfence }
 0x549 PF: > { %p22_p0 = scmp.ge.s32.totalorder %s2133_s10, 4   ;;  %s2535_s18 = smov %s1986_s19 }
 0x54a   : > { %s2536_s19 = smov %s1990_s20  ;;  %s2537_s20 = smov %s2146_s15 }
 0x54b   : > { %s2538_s21 = smov %s2133_s10  ;;  %24 = sbr.rel (!%p22_p0) target bundleno = 8 (0x8), region = 115 }
 0x552   :  { %1268 = vsyncpa [#allocation3], 1 }
 0x553   :  { %1270 = vsyncpa [#allocation3 + $0x1], 1 }
 0x554   :  { %1271 = vsyncpa [#allocation6], 1 }
 0x555   :  { %1273 = vsyncpa [#allocation6 + $0x1], 1 }
 0x556   :  { %1274 = vsyncpa [#allocation9], 1 }
 0x557   :  { %1275 = vsyncpa [#allocation4], 1 }
 0x558   :  { %1277 = vsyncpa [#allocation4 + $0x1], 1 }
 0x559   :  { %1278 = vsyncpa [#allocation12], 1 }

</bundles_post_ra>
